<compile_context>
chip_gen: v6e
topology: v6e:2x2x1
jax: 0.10.0
libtpu: 0.0.40
codegen_flags: <defaults>
</compile_context>

<pallas_src>
import jax
import jax.numpy as jnp
from jax.experimental import pallas as pl
from jax.experimental.pallas import tpu as pltpu

IN_SIZE = 1
H_SIZE = 30          # matches the PyTorch default hidden_size=30
OUT_SIZE = 1
SEQ = 8

LANE = 128           # per-gate lane-padded width (one full lane group)
GATES = 4            # PyTorch gate order along 4H: [i, f, g, o]
GW = GATES * LANE    # 512 lanes of gate pre-activations

# Packed parameter slab rows
_ROW_WHH0 = 0              # rows [0, 128)  : W_hh^T, K padded 30->128, gate-block lane padded
_ROW_WIH = LANE            # row 128        : W_ih^T (in_size==1), gate-block lane padded
_ROW_B = LANE + 1          # row 129        : b_ih + b_hh, gate-block lane padded
_ROW_WFC = LANE + 2        # row 130        : fc weight in lanes [0, H)
_ROW_BFC = LANE + 3        # row 131        : fc bias in lane 0
P_ROWS = LANE + 4          # 132


def _lstm_corona_kernel(x_ref, p_ref, out_ref):
    """One batch block of the LSTM_Corona forward.

    x_ref  : (TB, SEQ)     f32  -- TB independent sequences (in_size==1 squeezed).
    p_ref  : (P_ROWS, GW)  f32  -- packed, gate-block lane-padded parameters.
    out_ref: (TB, 1)       f32  -- pred[-1] per sequence.
    """
    tb = x_ref.shape[0]
    seq = x_ref.shape[1]            # static -> recurrence fully unrolled

    whh = p_ref[0:LANE, :]                       # (128, 512), zero rows past H
    wih = p_ref[_ROW_WIH:_ROW_WIH + 1, :]        # (1, 512)
    b = p_ref[_ROW_B:_ROW_B + 1, :]              # (1, 512)

    x = x_ref[...]                               # (TB, seq)

    h = jnp.zeros((tb, LANE), jnp.float32)
    c = jnp.zeros((tb, LANE), jnp.float32)

    for t in range(seq):
        # Input projection for step t on the VPU (in_size == 1): broadcast outer
        # product; independent of h/c so it is hoisted off the critical path.
        xp = x[:, t:t + 1] * wih + b             # (TB, 512)

        # Recurrent projection on the MXU; whh is loop-invariant.
        gates = xp + jnp.dot(h, whh, preferred_element_type=jnp.float32)

        # Gate blocks are 128-lane aligned -> whole-vreg selects, no XLU shifts.
        i = jax.nn.sigmoid(gates[:, 0 * LANE:1 * LANE])
        f = jax.nn.sigmoid(gates[:, 1 * LANE:2 * LANE])
        g = jnp.tanh(gates[:, 2 * LANE:3 * LANE])
        o = jax.nn.sigmoid(gates[:, 3 * LANE:4 * LANE])

        c = f * c + i * g                        # padded lanes stay exactly 0
        h = o * jnp.tanh(c)

    # fc on the last hidden state (out_size == 1): VPU multiply + lane reduction.
    wfc = p_ref[_ROW_WFC:_ROW_WFC + 1, 0:LANE]   # (1, 128), zero past H
    bfc = p_ref[_ROW_BFC:_ROW_BFC + 1, 0:1]      # (1, 1)
    out_ref[...] = jnp.sum(h * wfc, axis=-1, keepdims=True) + bfc


def pack_params(w_ih, w_hh, b_ih, b_hh, w_fc, b_fc):
    """Pack all module parameters into one (P_ROWS, GW) f32 slab.

    Each PyTorch gate block of 30 columns is placed at the start of its own
    128-lane group; W_hh^T K dimension is zero-padded 30 -> 128.
    """
    H = H_SIZE
    wih_t = jnp.transpose(w_ih).astype(jnp.float32)      # (1, 4H)
    whh_t = jnp.transpose(w_hh).astype(jnp.float32)      # (H, 4H)
    bias = (b_ih + b_hh).reshape(1, 4 * H).astype(jnp.float32)

    p = jnp.zeros((P_ROWS, GW), jnp.float32)
    for g in range(GATES):
        col = g * LANE
        p = p.at[0:H, col:col + H].set(whh_t[:, g * H:(g + 1) * H])
        p = p.at[_ROW_WIH, col:col + H].set(wih_t[0, g * H:(g + 1) * H])
        p = p.at[_ROW_B, col:col + H].set(bias[0, g * H:(g + 1) * H])
    p = p.at[_ROW_WFC, 0:H].set(w_fc.reshape(H).astype(jnp.float32))
    p = p.at[_ROW_BFC, 0].set(b_fc.reshape(()).astype(jnp.float32))
    return p


def lstm_corona_forward_batched(x_batched, w_ih, w_hh, b_ih, b_hh, w_fc, b_fc, *, tb=8):
    """x_batched: (B, seq, in_size) f32 with in_size == 1.  Returns (B, out_size):
    pred[-1] for each independent sequence (each starting from zero hidden state)."""
    B, seq, in_size = x_batched.shape
    assert in_size == IN_SIZE

    params = pack_params(w_ih, w_hh, b_ih, b_hh, w_fc, b_fc)
    x2 = x_batched.reshape(B, seq).astype(jnp.float32)   # in_size == 1 squeezed away

    pad = (-B) % tb
    if pad:
        x2 = jnp.concatenate([x2, jnp.zeros((pad, seq), jnp.float32)], axis=0)
    Bp = B + pad

    out = pl.pallas_call(
        _lstm_corona_kernel,
        out_shape=jax.ShapeDtypeStruct((Bp, OUT_SIZE), jnp.float32),
        grid=(Bp // tb,),
        in_specs=[
            pl.BlockSpec((tb, seq), lambda i: (i, 0)),        # batch block of sequences
            pl.BlockSpec((P_ROWS, GW), lambda i: (0, 0)),     # whole packed param slab
        ],
        out_specs=pl.BlockSpec((tb, OUT_SIZE), lambda i: (i, 0)),
        compiler_params=pltpu.CompilerParams(
            dimension_semantics=("parallel",)),               # shard batch across TCs (v7x)
    )(x2, params)
    return out[:B]


def lstm_corona_forward(x, w_ih, w_hh, b_ih, b_hh, w_fc, b_fc):
    """Single-sequence forward matching the PyTorch module call:
    x: (seq, in_size) f32 -> pred[-1] of shape (out_size,)."""
    out = lstm_corona_forward_batched(x[None], w_ih, w_hh, b_ih, b_hh, w_fc, b_fc)
    return out[0]


if __name__ == "__main__":
    key = jax.random.PRNGKey(0)
    k_x, k1, k2, k3, k4, k5, k6 = jax.random.split(key, 7)

    # Deterministic synthetic parameters (PyTorch-style uniform(-1/sqrt(H), 1/sqrt(H))).
    s = 1.0 / jnp.sqrt(jnp.float32(H_SIZE))
    w_ih = jax.random.uniform(k1, (4 * H_SIZE, IN_SIZE), jnp.float32, -s, s)
    w_hh = jax.random.uniform(k2, (4 * H_SIZE, H_SIZE), jnp.float32, -s, s)
    b_ih = jax.random.uniform(k3, (4 * H_SIZE,), jnp.float32, -s, s)
    b_hh = jax.random.uniform(k4, (4 * H_SIZE,), jnp.float32, -s, s)
    w_fc = jax.random.uniform(k5, (OUT_SIZE, H_SIZE), jnp.float32, -s, s)
    b_fc = jax.random.uniform(k6, (OUT_SIZE,), jnp.float32, -s, s)

    B = 16
    x_batched = jax.random.normal(k_x, (B, SEQ, IN_SIZE), jnp.float32)

    # Batched kernel (two grid steps of TB=8 sequences each).
    preds = lstm_corona_forward_batched(x_batched, w_ih, w_hh, b_ih, b_hh, w_fc, b_fc)
    jax.block_until_ready(preds)
    assert preds.shape == (B, OUT_SIZE)

    # Single-sequence path, exactly the PyTorch module's forward signature.
    pred_single = lstm_corona_forward(x_batched[0], w_ih, w_hh, b_ih, b_hh, w_fc, b_fc)
    jax.block_until_ready(pred_single)
    assert pred_single.shape == (OUT_SIZE,)

    # Pure-JAX reference (same math, lax.scan), vmapped over the batch.
    def ref_single(xs):
        wih_t = jnp.transpose(w_ih)
        whh_t = jnp.transpose(w_hh)
        b = (b_ih + b_hh).reshape(1, -1)
        H = H_SIZE

        def step(carry, xt):
            h, c = carry
            gates = xt.reshape(1, -1) @ wih_t + h @ whh_t + b
            i = jax.nn.sigmoid(gates[:, 0 * H:1 * H])
            f = jax.nn.sigmoid(gates[:, 1 * H:2 * H])
            g = jnp.tanh(gates[:, 2 * H:3 * H])
            o = jax.nn.sigmoid(gates[:, 3 * H:4 * H])
            c = f * c + i * g
            h = o * jnp.tanh(c)
            return (h, c), None

        h0 = jnp.zeros((1, H), jnp.float32)
        (h, _), _ = jax.lax.scan(step, (h0, h0), xs)
        return (h @ w_fc.T + b_fc)[0]

    ref = jax.vmap(ref_single)(x_batched)                 # (B, OUT_SIZE)
    assert jnp.allclose(preds, ref, atol=1e-5, rtol=1e-5)
    assert jnp.allclose(pred_single, ref[0], atol=1e-5, rtol=1e-5)
    print("KERNEL_OK")
</pallas_src>

<mosaic_0001>
module attributes {stable_mosaic.version = 11 : i64} {
  func.func @_lstm_corona_kernel(%arg0: i32, %arg1: memref<8x8xf32, #tpu.memory_space<vmem>>, %arg2: memref<132x512xf32, #tpu.memory_space<vmem>>, %arg3: memref<8x1xf32, #tpu.memory_space<vmem>>) attributes {dimension_semantics = [#tpu.dimension_semantics<parallel>], iteration_bounds = array<i64: 2>, scalar_prefetch = 0 : i64, scratch_operands = 0 : i64, tpu.core_type = #tpu.core_type<tc>, window_params = [{transform_indices = @transform_0, window_bounds = array<i64: 8, 8>}, {pipeline_mode = #tpu.pipeline_mode<synchronous>, transform_indices = @transform_1, window_bounds = array<i64: 132, 512>}, {transform_indices = @transform_2, window_bounds = array<i64: 8, 1>}]} {
    %c0 = arith.constant 0 : index
    %c0_0 = arith.constant 0 : index
    %0 = vector.load %arg2[%c0, %c0_0] : memref<132x512xf32, #tpu.memory_space<vmem>>, vector<128x512xf32>
    %c128 = arith.constant 128 : index
    %c0_1 = arith.constant 0 : index
    %1 = vector.load %arg2[%c128, %c0_1] : memref<132x512xf32, #tpu.memory_space<vmem>>, vector<1x512xf32>
    %c129 = arith.constant 129 : index
    %c0_2 = arith.constant 0 : index
    %2 = vector.load %arg2[%c129, %c0_2] : memref<132x512xf32, #tpu.memory_space<vmem>>, vector<1x512xf32>
    %c0_3 = arith.constant 0 : index
    %c0_4 = arith.constant 0 : index
    %3 = vector.load %arg1[%c0_3, %c0_4] : memref<8x8xf32, #tpu.memory_space<vmem>>, vector<8x8xf32>
    %cst = arith.constant 0.000000e+00 : f32
    %4 = vector.broadcast %cst : f32 to vector<8x128xf32>
    %cst_5 = arith.constant 0.000000e+00 : f32
    %5 = vector.broadcast %cst_5 : f32 to vector<8x128xf32>
    %6 = vector.extract_strided_slice %3 {offsets = [0, 0], sizes = [8, 1], strides = [1, 1]} : vector<8x8xf32> to vector<8x1xf32>
    %7 = vector.broadcast %6 : vector<8x1xf32> to vector<8x512xf32>
    %8 = vector.broadcast %1 : vector<1x512xf32> to vector<8x512xf32>
    %9 = arith.mulf %7, %8 : vector<8x512xf32>
    %10 = vector.broadcast %2 : vector<1x512xf32> to vector<8x512xf32>
    %11 = arith.addf %9, %10 : vector<8x512xf32>
    %cst_6 = arith.constant dense<0.000000e+00> : vector<8x512xf32>
    %12 = tpu.matmul %4, %0, %cst_6 {dimension_numbers = #tpu.dot_dimension_numbers<[1], [0], [0], [1], [0, 0, 1, 1], [], []>} : vector<8x128xf32>, vector<128x512xf32>, vector<8x512xf32> -> vector<8x512xf32>
    %13 = arith.addf %11, %12 : vector<8x512xf32>
    %14 = vector.extract_strided_slice %13 {offsets = [0, 0], sizes = [8, 128], strides = [1, 1]} : vector<8x512xf32> to vector<8x128xf32>
    %15 = arith.negf %14 : vector<8x128xf32>
    %16 = math.exp %15 : vector<8x128xf32>
    %cst_7 = arith.constant 1.000000e+00 : f32
    %17 = vector.broadcast %cst_7 : f32 to vector<8x128xf32>
    %18 = arith.addf %17, %16 : vector<8x128xf32>
    %19 = arith.divf %17, %18 : vector<8x128xf32>
    %20 = vector.extract_strided_slice %13 {offsets = [0, 128], sizes = [8, 128], strides = [1, 1]} : vector<8x512xf32> to vector<8x128xf32>
    %21 = arith.negf %20 : vector<8x128xf32>
    %22 = math.exp %21 : vector<8x128xf32>
    %cst_8 = arith.constant 1.000000e+00 : f32
    %23 = vector.broadcast %cst_8 : f32 to vector<8x128xf32>
    %24 = arith.addf %23, %22 : vector<8x128xf32>
    %25 = arith.divf %23, %24 : vector<8x128xf32>
    %26 = vector.extract_strided_slice %13 {offsets = [0, 256], sizes = [8, 128], strides = [1, 1]} : vector<8x512xf32> to vector<8x128xf32>
    %27 = math.tanh %26 : vector<8x128xf32>
    %28 = vector.extract_strided_slice %13 {offsets = [0, 384], sizes = [8, 128], strides = [1, 1]} : vector<8x512xf32> to vector<8x128xf32>
    %29 = arith.negf %28 : vector<8x128xf32>
    %30 = math.exp %29 : vector<8x128xf32>
    %cst_9 = arith.constant 1.000000e+00 : f32
    %31 = vector.broadcast %cst_9 : f32 to vector<8x128xf32>
    %32 = arith.addf %31, %30 : vector<8x128xf32>
    %33 = arith.divf %31, %32 : vector<8x128xf32>
    %34 = arith.mulf %25, %5 : vector<8x128xf32>
    %35 = arith.mulf %19, %27 : vector<8x128xf32>
    %36 = arith.addf %34, %35 : vector<8x128xf32>
    %37 = math.tanh %36 : vector<8x128xf32>
    %38 = arith.mulf %33, %37 : vector<8x128xf32>
    %39 = vector.extract_strided_slice %3 {offsets = [0, 1], sizes = [8, 1], strides = [1, 1]} : vector<8x8xf32> to vector<8x1xf32>
    %40 = vector.broadcast %39 : vector<8x1xf32> to vector<8x512xf32>
    %41 = vector.broadcast %1 : vector<1x512xf32> to vector<8x512xf32>
    %42 = arith.mulf %40, %41 : vector<8x512xf32>
    %43 = vector.broadcast %2 : vector<1x512xf32> to vector<8x512xf32>
    %44 = arith.addf %42, %43 : vector<8x512xf32>
    %cst_10 = arith.constant dense<0.000000e+00> : vector<8x512xf32>
    %45 = tpu.matmul %38, %0, %cst_10 {dimension_numbers = #tpu.dot_dimension_numbers<[1], [0], [0], [1], [0, 0, 1, 1], [], []>} : vector<8x128xf32>, vector<128x512xf32>, vector<8x512xf32> -> vector<8x512xf32>
    %46 = arith.addf %44, %45 : vector<8x512xf32>
    %47 = vector.extract_strided_slice %46 {offsets = [0, 0], sizes = [8, 128], strides = [1, 1]} : vector<8x512xf32> to vector<8x128xf32>
    %48 = arith.negf %47 : vector<8x128xf32>
    %49 = math.exp %48 : vector<8x128xf32>
    %cst_11 = arith.constant 1.000000e+00 : f32
    %50 = vector.broadcast %cst_11 : f32 to vector<8x128xf32>
    %51 = arith.addf %50, %49 : vector<8x128xf32>
    %52 = arith.divf %50, %51 : vector<8x128xf32>
    %53 = vector.extract_strided_slice %46 {offsets = [0, 128], sizes = [8, 128], strides = [1, 1]} : vector<8x512xf32> to vector<8x128xf32>
    %54 = arith.negf %53 : vector<8x128xf32>
    %55 = math.exp %54 : vector<8x128xf32>
    %cst_12 = arith.constant 1.000000e+00 : f32
    %56 = vector.broadcast %cst_12 : f32 to vector<8x128xf32>
    %57 = arith.addf %56, %55 : vector<8x128xf32>
    %58 = arith.divf %56, %57 : vector<8x128xf32>
    %59 = vector.extract_strided_slice %46 {offsets = [0, 256], sizes = [8, 128], strides = [1, 1]} : vector<8x512xf32> to vector<8x128xf32>
    %60 = math.tanh %59 : vector<8x128xf32>
    %61 = vector.extract_strided_slice %46 {offsets = [0, 384], sizes = [8, 128], strides = [1, 1]} : vector<8x512xf32> to vector<8x128xf32>
    %62 = arith.negf %61 : vector<8x128xf32>
    %63 = math.exp %62 : vector<8x128xf32>
    %cst_13 = arith.constant 1.000000e+00 : f32
    %64 = vector.broadcast %cst_13 : f32 to vector<8x128xf32>
    %65 = arith.addf %64, %63 : vector<8x128xf32>
    %66 = arith.divf %64, %65 : vector<8x128xf32>
    %67 = arith.mulf %58, %36 : vector<8x128xf32>
    %68 = arith.mulf %52, %60 : vector<8x128xf32>
    %69 = arith.addf %67, %68 : vector<8x128xf32>
    %70 = math.tanh %69 : vector<8x128xf32>
    %71 = arith.mulf %66, %70 : vector<8x128xf32>
    %72 = vector.extract_strided_slice %3 {offsets = [0, 2], sizes = [8, 1], strides = [1, 1]} : vector<8x8xf32> to vector<8x1xf32>
    %73 = vector.broadcast %72 : vector<8x1xf32> to vector<8x512xf32>
    %74 = vector.broadcast %1 : vector<1x512xf32> to vector<8x512xf32>
    %75 = arith.mulf %73, %74 : vector<8x512xf32>
    %76 = vector.broadcast %2 : vector<1x512xf32> to vector<8x512xf32>
    %77 = arith.addf %75, %76 : vector<8x512xf32>
    %cst_14 = arith.constant dense<0.000000e+00> : vector<8x512xf32>
    %78 = tpu.matmul %71, %0, %cst_14 {dimension_numbers = #tpu.dot_dimension_numbers<[1], [0], [0], [1], [0, 0, 1, 1], [], []>} : vector<8x128xf32>, vector<128x512xf32>, vector<8x512xf32> -> vector<8x512xf32>
    %79 = arith.addf %77, %78 : vector<8x512xf32>
    %80 = vector.extract_strided_slice %79 {offsets = [0, 0], sizes = [8, 128], strides = [1, 1]} : vector<8x512xf32> to vector<8x128xf32>
    %81 = arith.negf %80 : vector<8x128xf32>
    %82 = math.exp %81 : vector<8x128xf32>
    %cst_15 = arith.constant 1.000000e+00 : f32
    %83 = vector.broadcast %cst_15 : f32 to vector<8x128xf32>
    %84 = arith.addf %83, %82 : vector<8x128xf32>
    %85 = arith.divf %83, %84 : vector<8x128xf32>
    %86 = vector.extract_strided_slice %79 {offsets = [0, 128], sizes = [8, 128], strides = [1, 1]} : vector<8x512xf32> to vector<8x128xf32>
    %87 = arith.negf %86 : vector<8x128xf32>
    %88 = math.exp %87 : vector<8x128xf32>
    %cst_16 = arith.constant 1.000000e+00 : f32
    %89 = vector.broadcast %cst_16 : f32 to vector<8x128xf32>
    %90 = arith.addf %89, %88 : vector<8x128xf32>
    %91 = arith.divf %89, %90 : vector<8x128xf32>
    %92 = vector.extract_strided_slice %79 {offsets = [0, 256], sizes = [8, 128], strides = [1, 1]} : vector<8x512xf32> to vector<8x128xf32>
    %93 = math.tanh %92 : vector<8x128xf32>
    %94 = vector.extract_strided_slice %79 {offsets = [0, 384], sizes = [8, 128], strides = [1, 1]} : vector<8x512xf32> to vector<8x128xf32>
    %95 = arith.negf %94 : vector<8x128xf32>
    %96 = math.exp %95 : vector<8x128xf32>
    %cst_17 = arith.constant 1.000000e+00 : f32
    %97 = vector.broadcast %cst_17 : f32 to vector<8x128xf32>
    %98 = arith.addf %97, %96 : vector<8x128xf32>
    %99 = arith.divf %97, %98 : vector<8x128xf32>
    %100 = arith.mulf %91, %69 : vector<8x128xf32>
    %101 = arith.mulf %85, %93 : vector<8x128xf32>
    %102 = arith.addf %100, %101 : vector<8x128xf32>
    %103 = math.tanh %102 : vector<8x128xf32>
    %104 = arith.mulf %99, %103 : vector<8x128xf32>
    %105 = vector.extract_strided_slice %3 {offsets = [0, 3], sizes = [8, 1], strides = [1, 1]} : vector<8x8xf32> to vector<8x1xf32>
    %106 = vector.broadcast %105 : vector<8x1xf32> to vector<8x512xf32>
    %107 = vector.broadcast %1 : vector<1x512xf32> to vector<8x512xf32>
    %108 = arith.mulf %106, %107 : vector<8x512xf32>
    %109 = vector.broadcast %2 : vector<1x512xf32> to vector<8x512xf32>
    %110 = arith.addf %108, %109 : vector<8x512xf32>
    %cst_18 = arith.constant dense<0.000000e+00> : vector<8x512xf32>
    %111 = tpu.matmul %104, %0, %cst_18 {dimension_numbers = #tpu.dot_dimension_numbers<[1], [0], [0], [1], [0, 0, 1, 1], [], []>} : vector<8x128xf32>, vector<128x512xf32>, vector<8x512xf32> -> vector<8x512xf32>
    %112 = arith.addf %110, %111 : vector<8x512xf32>
    %113 = vector.extract_strided_slice %112 {offsets = [0, 0], sizes = [8, 128], strides = [1, 1]} : vector<8x512xf32> to vector<8x128xf32>
    %114 = arith.negf %113 : vector<8x128xf32>
    %115 = math.exp %114 : vector<8x128xf32>
    %cst_19 = arith.constant 1.000000e+00 : f32
    %116 = vector.broadcast %cst_19 : f32 to vector<8x128xf32>
    %117 = arith.addf %116, %115 : vector<8x128xf32>
    %118 = arith.divf %116, %117 : vector<8x128xf32>
    %119 = vector.extract_strided_slice %112 {offsets = [0, 128], sizes = [8, 128], strides = [1, 1]} : vector<8x512xf32> to vector<8x128xf32>
    %120 = arith.negf %119 : vector<8x128xf32>
    %121 = math.exp %120 : vector<8x128xf32>
    %cst_20 = arith.constant 1.000000e+00 : f32
    %122 = vector.broadcast %cst_20 : f32 to vector<8x128xf32>
    %123 = arith.addf %122, %121 : vector<8x128xf32>
    %124 = arith.divf %122, %123 : vector<8x128xf32>
    %125 = vector.extract_strided_slice %112 {offsets = [0, 256], sizes = [8, 128], strides = [1, 1]} : vector<8x512xf32> to vector<8x128xf32>
    %126 = math.tanh %125 : vector<8x128xf32>
    %127 = vector.extract_strided_slice %112 {offsets = [0, 384], sizes = [8, 128], strides = [1, 1]} : vector<8x512xf32> to vector<8x128xf32>
    %128 = arith.negf %127 : vector<8x128xf32>
    %129 = math.exp %128 : vector<8x128xf32>
    %cst_21 = arith.constant 1.000000e+00 : f32
    %130 = vector.broadcast %cst_21 : f32 to vector<8x128xf32>
    %131 = arith.addf %130, %129 : vector<8x128xf32>
    %132 = arith.divf %130, %131 : vector<8x128xf32>
    %133 = arith.mulf %124, %102 : vector<8x128xf32>
    %134 = arith.mulf %118, %126 : vector<8x128xf32>
    %135 = arith.addf %133, %134 : vector<8x128xf32>
    %136 = math.tanh %135 : vector<8x128xf32>
    %137 = arith.mulf %132, %136 : vector<8x128xf32>
    %138 = vector.extract_strided_slice %3 {offsets = [0, 4], sizes = [8, 1], strides = [1, 1]} : vector<8x8xf32> to vector<8x1xf32>
    %139 = vector.broadcast %138 : vector<8x1xf32> to vector<8x512xf32>
    %140 = vector.broadcast %1 : vector<1x512xf32> to vector<8x512xf32>
    %141 = arith.mulf %139, %140 : vector<8x512xf32>
    %142 = vector.broadcast %2 : vector<1x512xf32> to vector<8x512xf32>
    %143 = arith.addf %141, %142 : vector<8x512xf32>
    %cst_22 = arith.constant dense<0.000000e+00> : vector<8x512xf32>
    %144 = tpu.matmul %137, %0, %cst_22 {dimension_numbers = #tpu.dot_dimension_numbers<[1], [0], [0], [1], [0, 0, 1, 1], [], []>} : vector<8x128xf32>, vector<128x512xf32>, vector<8x512xf32> -> vector<8x512xf32>
    %145 = arith.addf %143, %144 : vector<8x512xf32>
    %146 = vector.extract_strided_slice %145 {offsets = [0, 0], sizes = [8, 128], strides = [1, 1]} : vector<8x512xf32> to vector<8x128xf32>
    %147 = arith.negf %146 : vector<8x128xf32>
    %148 = math.exp %147 : vector<8x128xf32>
    %cst_23 = arith.constant 1.000000e+00 : f32
    %149 = vector.broadcast %cst_23 : f32 to vector<8x128xf32>
    %150 = arith.addf %149, %148 : vector<8x128xf32>
    %151 = arith.divf %149, %150 : vector<8x128xf32>
    %152 = vector.extract_strided_slice %145 {offsets = [0, 128], sizes = [8, 128], strides = [1, 1]} : vector<8x512xf32> to vector<8x128xf32>
    %153 = arith.negf %152 : vector<8x128xf32>
    %154 = math.exp %153 : vector<8x128xf32>
    %cst_24 = arith.constant 1.000000e+00 : f32
    %155 = vector.broadcast %cst_24 : f32 to vector<8x128xf32>
    %156 = arith.addf %155, %154 : vector<8x128xf32>
    %157 = arith.divf %155, %156 : vector<8x128xf32>
    %158 = vector.extract_strided_slice %145 {offsets = [0, 256], sizes = [8, 128], strides = [1, 1]} : vector<8x512xf32> to vector<8x128xf32>
    %159 = math.tanh %158 : vector<8x128xf32>
    %160 = vector.extract_strided_slice %145 {offsets = [0, 384], sizes = [8, 128], strides = [1, 1]} : vector<8x512xf32> to vector<8x128xf32>
    %161 = arith.negf %160 : vector<8x128xf32>
    %162 = math.exp %161 : vector<8x128xf32>
    %cst_25 = arith.constant 1.000000e+00 : f32
    %163 = vector.broadcast %cst_25 : f32 to vector<8x128xf32>
    %164 = arith.addf %163, %162 : vector<8x128xf32>
    %165 = arith.divf %163, %164 : vector<8x128xf32>
    %166 = arith.mulf %157, %135 : vector<8x128xf32>
    %167 = arith.mulf %151, %159 : vector<8x128xf32>
    %168 = arith.addf %166, %167 : vector<8x128xf32>
    %169 = math.tanh %168 : vector<8x128xf32>
    %170 = arith.mulf %165, %169 : vector<8x128xf32>
    %171 = vector.extract_strided_slice %3 {offsets = [0, 5], sizes = [8, 1], strides = [1, 1]} : vector<8x8xf32> to vector<8x1xf32>
    %172 = vector.broadcast %171 : vector<8x1xf32> to vector<8x512xf32>
    %173 = vector.broadcast %1 : vector<1x512xf32> to vector<8x512xf32>
    %174 = arith.mulf %172, %173 : vector<8x512xf32>
    %175 = vector.broadcast %2 : vector<1x512xf32> to vector<8x512xf32>
    %176 = arith.addf %174, %175 : vector<8x512xf32>
    %cst_26 = arith.constant dense<0.000000e+00> : vector<8x512xf32>
    %177 = tpu.matmul %170, %0, %cst_26 {dimension_numbers = #tpu.dot_dimension_numbers<[1], [0], [0], [1], [0, 0, 1, 1], [], []>} : vector<8x128xf32>, vector<128x512xf32>, vector<8x512xf32> -> vector<8x512xf32>
    %178 = arith.addf %176, %177 : vector<8x512xf32>
    %179 = vector.extract_strided_slice %178 {offsets = [0, 0], sizes = [8, 128], strides = [1, 1]} : vector<8x512xf32> to vector<8x128xf32>
    %180 = arith.negf %179 : vector<8x128xf32>
    %181 = math.exp %180 : vector<8x128xf32>
    %cst_27 = arith.constant 1.000000e+00 : f32
    %182 = vector.broadcast %cst_27 : f32 to vector<8x128xf32>
    %183 = arith.addf %182, %181 : vector<8x128xf32>
    %184 = arith.divf %182, %183 : vector<8x128xf32>
    %185 = vector.extract_strided_slice %178 {offsets = [0, 128], sizes = [8, 128], strides = [1, 1]} : vector<8x512xf32> to vector<8x128xf32>
    %186 = arith.negf %185 : vector<8x128xf32>
    %187 = math.exp %186 : vector<8x128xf32>
    %cst_28 = arith.constant 1.000000e+00 : f32
    %188 = vector.broadcast %cst_28 : f32 to vector<8x128xf32>
    %189 = arith.addf %188, %187 : vector<8x128xf32>
    %190 = arith.divf %188, %189 : vector<8x128xf32>
    %191 = vector.extract_strided_slice %178 {offsets = [0, 256], sizes = [8, 128], strides = [1, 1]} : vector<8x512xf32> to vector<8x128xf32>
    %192 = math.tanh %191 : vector<8x128xf32>
    %193 = vector.extract_strided_slice %178 {offsets = [0, 384], sizes = [8, 128], strides = [1, 1]} : vector<8x512xf32> to vector<8x128xf32>
    %194 = arith.negf %193 : vector<8x128xf32>
    %195 = math.exp %194 : vector<8x128xf32>
    %cst_29 = arith.constant 1.000000e+00 : f32
    %196 = vector.broadcast %cst_29 : f32 to vector<8x128xf32>
    %197 = arith.addf %196, %195 : vector<8x128xf32>
    %198 = arith.divf %196, %197 : vector<8x128xf32>
    %199 = arith.mulf %190, %168 : vector<8x128xf32>
    %200 = arith.mulf %184, %192 : vector<8x128xf32>
    %201 = arith.addf %199, %200 : vector<8x128xf32>
    %202 = math.tanh %201 : vector<8x128xf32>
    %203 = arith.mulf %198, %202 : vector<8x128xf32>
    %204 = vector.extract_strided_slice %3 {offsets = [0, 6], sizes = [8, 1], strides = [1, 1]} : vector<8x8xf32> to vector<8x1xf32>
    %205 = vector.broadcast %204 : vector<8x1xf32> to vector<8x512xf32>
    %206 = vector.broadcast %1 : vector<1x512xf32> to vector<8x512xf32>
    %207 = arith.mulf %205, %206 : vector<8x512xf32>
    %208 = vector.broadcast %2 : vector<1x512xf32> to vector<8x512xf32>
    %209 = arith.addf %207, %208 : vector<8x512xf32>
    %cst_30 = arith.constant dense<0.000000e+00> : vector<8x512xf32>
    %210 = tpu.matmul %203, %0, %cst_30 {dimension_numbers = #tpu.dot_dimension_numbers<[1], [0], [0], [1], [0, 0, 1, 1], [], []>} : vector<8x128xf32>, vector<128x512xf32>, vector<8x512xf32> -> vector<8x512xf32>
    %211 = arith.addf %209, %210 : vector<8x512xf32>
    %212 = vector.extract_strided_slice %211 {offsets = [0, 0], sizes = [8, 128], strides = [1, 1]} : vector<8x512xf32> to vector<8x128xf32>
    %213 = arith.negf %212 : vector<8x128xf32>
    %214 = math.exp %213 : vector<8x128xf32>
    %cst_31 = arith.constant 1.000000e+00 : f32
    %215 = vector.broadcast %cst_31 : f32 to vector<8x128xf32>
    %216 = arith.addf %215, %214 : vector<8x128xf32>
    %217 = arith.divf %215, %216 : vector<8x128xf32>
    %218 = vector.extract_strided_slice %211 {offsets = [0, 128], sizes = [8, 128], strides = [1, 1]} : vector<8x512xf32> to vector<8x128xf32>
    %219 = arith.negf %218 : vector<8x128xf32>
    %220 = math.exp %219 : vector<8x128xf32>
    %cst_32 = arith.constant 1.000000e+00 : f32
    %221 = vector.broadcast %cst_32 : f32 to vector<8x128xf32>
    %222 = arith.addf %221, %220 : vector<8x128xf32>
    %223 = arith.divf %221, %222 : vector<8x128xf32>
    %224 = vector.extract_strided_slice %211 {offsets = [0, 256], sizes = [8, 128], strides = [1, 1]} : vector<8x512xf32> to vector<8x128xf32>
    %225 = math.tanh %224 : vector<8x128xf32>
    %226 = vector.extract_strided_slice %211 {offsets = [0, 384], sizes = [8, 128], strides = [1, 1]} : vector<8x512xf32> to vector<8x128xf32>
    %227 = arith.negf %226 : vector<8x128xf32>
    %228 = math.exp %227 : vector<8x128xf32>
    %cst_33 = arith.constant 1.000000e+00 : f32
    %229 = vector.broadcast %cst_33 : f32 to vector<8x128xf32>
    %230 = arith.addf %229, %228 : vector<8x128xf32>
    %231 = arith.divf %229, %230 : vector<8x128xf32>
    %232 = arith.mulf %223, %201 : vector<8x128xf32>
    %233 = arith.mulf %217, %225 : vector<8x128xf32>
    %234 = arith.addf %232, %233 : vector<8x128xf32>
    %235 = math.tanh %234 : vector<8x128xf32>
    %236 = arith.mulf %231, %235 : vector<8x128xf32>
    %237 = vector.extract_strided_slice %3 {offsets = [0, 7], sizes = [8, 1], strides = [1, 1]} : vector<8x8xf32> to vector<8x1xf32>
    %238 = vector.broadcast %237 : vector<8x1xf32> to vector<8x512xf32>
    %239 = vector.broadcast %1 : vector<1x512xf32> to vector<8x512xf32>
    %240 = arith.mulf %238, %239 : vector<8x512xf32>
    %241 = vector.broadcast %2 : vector<1x512xf32> to vector<8x512xf32>
    %242 = arith.addf %240, %241 : vector<8x512xf32>
    %cst_34 = arith.constant dense<0.000000e+00> : vector<8x512xf32>
    %243 = tpu.matmul %236, %0, %cst_34 {dimension_numbers = #tpu.dot_dimension_numbers<[1], [0], [0], [1], [0, 0, 1, 1], [], []>} : vector<8x128xf32>, vector<128x512xf32>, vector<8x512xf32> -> vector<8x512xf32>
    %244 = arith.addf %242, %243 : vector<8x512xf32>
    %245 = vector.extract_strided_slice %244 {offsets = [0, 0], sizes = [8, 128], strides = [1, 1]} : vector<8x512xf32> to vector<8x128xf32>
    %246 = arith.negf %245 : vector<8x128xf32>
    %247 = math.exp %246 : vector<8x128xf32>
    %cst_35 = arith.constant 1.000000e+00 : f32
    %248 = vector.broadcast %cst_35 : f32 to vector<8x128xf32>
    %249 = arith.addf %248, %247 : vector<8x128xf32>
    %250 = arith.divf %248, %249 : vector<8x128xf32>
    %251 = vector.extract_strided_slice %244 {offsets = [0, 128], sizes = [8, 128], strides = [1, 1]} : vector<8x512xf32> to vector<8x128xf32>
    %252 = arith.negf %251 : vector<8x128xf32>
    %253 = math.exp %252 : vector<8x128xf32>
    %cst_36 = arith.constant 1.000000e+00 : f32
    %254 = vector.broadcast %cst_36 : f32 to vector<8x128xf32>
    %255 = arith.addf %254, %253 : vector<8x128xf32>
    %256 = arith.divf %254, %255 : vector<8x128xf32>
    %257 = vector.extract_strided_slice %244 {offsets = [0, 256], sizes = [8, 128], strides = [1, 1]} : vector<8x512xf32> to vector<8x128xf32>
    %258 = math.tanh %257 : vector<8x128xf32>
    %259 = vector.extract_strided_slice %244 {offsets = [0, 384], sizes = [8, 128], strides = [1, 1]} : vector<8x512xf32> to vector<8x128xf32>
    %260 = arith.negf %259 : vector<8x128xf32>
    %261 = math.exp %260 : vector<8x128xf32>
    %cst_37 = arith.constant 1.000000e+00 : f32
    %262 = vector.broadcast %cst_37 : f32 to vector<8x128xf32>
    %263 = arith.addf %262, %261 : vector<8x128xf32>
    %264 = arith.divf %262, %263 : vector<8x128xf32>
    %265 = arith.mulf %256, %234 : vector<8x128xf32>
    %266 = arith.mulf %250, %258 : vector<8x128xf32>
    %267 = arith.addf %265, %266 : vector<8x128xf32>
    %268 = math.tanh %267 : vector<8x128xf32>
    %269 = arith.mulf %264, %268 : vector<8x128xf32>
    %c130 = arith.constant 130 : index
    %c0_38 = arith.constant 0 : index
    %270 = vector.load %arg2[%c130, %c0_38] : memref<132x512xf32, #tpu.memory_space<vmem>>, vector<1x128xf32>
    %c131 = arith.constant 131 : index
    %c0_39 = arith.constant 0 : index
    %271 = vector.load %arg2[%c131, %c0_39] : memref<132x512xf32, #tpu.memory_space<vmem>>, vector<1x1xf32>
    %272 = vector.broadcast %270 : vector<1x128xf32> to vector<8x128xf32>
    %273 = arith.mulf %269, %272 : vector<8x128xf32>
    %cst_40 = arith.constant dense<0.000000e+00> : vector<8xf32>
    %274 = vector.multi_reduction <add>, %273, %cst_40 [1] : vector<8x128xf32> to vector<8xf32>
    %275 = vector.shape_cast %274 : vector<8xf32> to vector<8x1xf32>
    %276 = vector.broadcast %271 : vector<1x1xf32> to vector<8x1xf32>
    %277 = arith.addf %275, %276 : vector<8x1xf32>
    %c0_41 = arith.constant 0 : index
    %c0_42 = arith.constant 0 : index
    %278 = vector.load %arg3[%c0_41, %c0_42] : memref<8x1xf32, #tpu.memory_space<vmem>>, vector<8x1xf32>
    tpu.vector_store %arg3[%c0_41, %c0_42], %277 {strides = array<i32>} : memref<8x1xf32, #tpu.memory_space<vmem>>, vector<8x1xf32>,
    return
  }
  func.func @transform_0(%arg0: i32) -> (i32, i32) {
    %c0_i32 = arith.constant 0 : i32
    %c0_i32_0 = arith.constant 0 : i32
    return %arg0, %c0_i32 : i32, i32
  }
  func.func @transform_1(%arg0: i32) -> (i32, i32) {
    %c0_i32 = arith.constant 0 : i32
    %c0_i32_0 = arith.constant 0 : i32
    %c0_i32_1 = arith.constant 0 : i32
    return %c0_i32, %c0_i32_0 : i32, i32
  }
  func.func @transform_2(%arg0: i32) -> (i32, i32) {
    %c0_i32 = arith.constant 0 : i32
    %c0_i32_0 = arith.constant 0 : i32
    return %arg0, %c0_i32 : i32, i32
  }
}

</mosaic_0001>

<bundles_post_ra>
// kernel: tpu_custom_call.1
= control target key start
LH: loop header
LB: loop body
LE: loop exit
PB: predicated region body
PF: predicated region fallthrough
CT: control target
= control target key end

     0   :  { %7 = vsyncpa [#allocation3], 0  ;;  %s2127_s9 = smov 0   ;;  %s3081_s0 = inlined_call_operand.vmem [shape: f32[16,8], index: 0, kind: input, shape index: {}]   ;;  %s3082_s1 = inlined_call_operand.hbm [shape: f32[132,512], index: 1, kind: input, shape index: {}]   ;;  %s3083_s2 = inlined_call_operand.vmem [shape: f32[16,1], index: 2, kind: output, shape index: {}]  }
   0x1 LB: > { %s2133_s10 = sadd.s32 4294967295, %s2098_s9   ;;  %p1797_p0 = scmp.ge.s32.totalorder %s2098_s9, 1  ;;  %s2098_s9 = sphi %s2127_s9, %s13_s9  }
   0x2   : > { %p91_p1 = scmp.lt.s32.totalorder %s2098_s9, 3  ;;  %s2100_s11 = smov [#allocation2]  }
   0x3   : > { %s103_s12 = sshll.u32 %s2100_s11, 4  ;;  %p1838_p3 = scmp.eq.s32.totalorder %s2133_s10, 0  ;;  %s104_s12 = int_to_ptr.vmem [resolvable:$true] %s103_s12 }
   0x4   : > { %p2137_p2 = pnand %p1797_p0, %p91_p1  ;;  %s2073_s14 = scalar_lea.vmem %s104_s12, 8704 }
   0x5   : > { %p2074_p7 = scmp.ne.s32.totalorder %s104_s12, %s2073_s14  ;;  %p2081_p10 = scmp.lt.s32.totalorder %s104_s12, %s104_s12 }
   0x6   : > { %p1834_p4 = pneg %p2137_p2  ;;  %p2082_p11 = scmp.lt.s32.totalorder %s2073_s14, %s2073_s14 }
   0x8   : > { %p1835_p5 = pnand %p1838_p3, %p1834_p4  ;;  %p2083_p12 = por %p2082_p11, %p2081_p10 }
   0xa   : > { %p2064_p6 = pneg %p1835_p5 }
   0xc   : > { %p2076_p8 = pnand %p2074_p7, %p2064_p6 }
   0xe   : > { %p2077_p9 = pneg %p2076_p8 }
  0x10   : > { %p2084_p13 = pnand %p2083_p12, %p2077_p9 }
  0x12   : > { %2087 = shalt.err (!%p2084_p13)
}
  0x13   : > { %s2101_s15 = smov 512   ;;  %s2102_s16 = smov 32  }
  0x14   : > { %1837 = dma.hbm_to_vmem [thread:$0]  (!%p1835_p5), %s3082_s1, 8704, %s104_s12, [#allocation3], %s2101_s15, %s2101_s15, %s2102_s16  }
  0x15   : > { %126 = sbr.rel (%p2137_p2) target bundleno = 2196 (0x894), region = 28 }
  0x1a   : > { %2093 = dma.done.wait (%p1838_p3), [#allocation3], 8704  }
  0x1b   : > { %2095 = vsyncadd (%p1838_p3), [#allocation3], 4294958592  ;;  %v3084_v0 = vmov 0.0   ;;  %v2104_v1 = vmov 0   ;;  %v2157_v2 = vld [vmem:[#allocation2 + $0x1e8] sm:$0xff]  ;;  %v2159_v3 = vld [vmem:[#allocation2 + $0x1f8] sm:$0xff] }
  0x1c   : > { %342 = vmatprep.mubr.f32.mxu0 %v3084_v0  ;;  %413 = vmatprep.mubr.f32.mxu1 %v3084_v0  ;;  %3202 = vst [vmem:[#allocation5_spill] sm:$0xff] %v2157_v2  ;;  %3203 = vst [vmem:[#allocation6_spill] sm:$0xff] %v2159_v3  ;;  %v2161_v4 = vld [vmem:[#allocation2 + $0x1e0] sm:$0xff]  ;;  %v2165_v5 = vld [vmem:[#allocation2 + $0x1f0] sm:$0xff]  ;;  %p146_p0 = scmp.lt.s32.totalorder %s2133_s10, 1  ;;  %vm1728_vm0 = vcmask 7168  }
  0x1d   : > { %1860 = vset.pattern.permute.xlu0 %v2104_v1  ;;  %278 = vmatprep.subr.mxu0 %v2157_v2  ;;  %v2167_v6 = vld [vmem:[#allocation2 + $0x1c8] sm:$0xff]  ;;  %v2169_v7 = vld [vmem:[#allocation2 + $0x1d8] sm:$0xff]  ;;  %v2173_v8 = vld [vmem:[#allocation2 + $0x1c0] sm:$0xff] }
  0x1e   : > { %349 = vmatprep.subr.mxu1 %v2159_v3  ;;  %279 = vmatpush1.msra.mxu0 %v2161_v4  ;;  %v2175_v9 = vld [vmem:[#allocation2 + $0x1d0] sm:$0xff]  ;;  %v2177_v10 = vld [vmem:[#allocation2 + $0x1a8] sm:$0xff]  ;;  %v2181_v11 = vld [vmem:[#allocation2 + $0x1b8] sm:$0xff]  ;;  %s3405_s10 = smov (!%p146_p0, %s2133_s10), 1 }
  0x1f   : > { %350 = vmatpush1.msra.mxu1 %v2165_v5  ;;  %280 = vmatprep.subr.mxu0 %v2167_v6  ;;  %v2183_v12 = vld [vmem:[#allocation2 + $0x1a0] sm:$0xff]  ;;  %v2185_v13 = vld [vmem:[#allocation2 + $0x1b0] sm:$0xff]  ;;  %v2189_v14 = vld [vmem:[#allocation2 + $0x188] sm:$0xff]  ;;  %s1802_s19 = sshll.u32 %s3405_s10, 3 }
  0x20   : > { %351 = vmatprep.subr.mxu1 %v2169_v7  ;;  %281 = vmatpush1.msra.mxu0 %v2173_v8  ;;  %v2191_v15 = vld [vmem:[#allocation2 + $0x198] sm:$0xff]  ;;  %v2195_v16 = vld [vmem:[#allocation2 + $0x180] sm:$0xff]  ;;  %v2197_v17 = vld [vmem:[#allocation2 + $0x190] sm:$0xff]  ;;  %s2349_s22 = scalar_lea.vmem %s3081_s0, %s1802_s19  ;;  %s153_s25 = scalar_lea.vmem %s3083_s2, %s1802_s19 }
  0x21   : > { %352 = vmatpush1.msra.mxu1 %v2175_v9  ;;  %282 = vmatprep.subr.mxu0 %v2177_v10  ;;  %v2201_v18 = vld [vmem:[#allocation2 + $0x168] sm:$0xff]  ;;  %v2203_v19 = vld [vmem:[#allocation2 + $0x178] sm:$0xff]  ;;  %v2207_v20 = vld [vmem:[#allocation2 + $0x160] sm:$0xff] }
  0x22   : > { %353 = vmatprep.subr.mxu1 %v2181_v11  ;;  %283 = vmatpush1.msra.mxu0 %v2183_v12  ;;  %v2209_v21 = vld [vmem:[#allocation2 + $0x170] sm:$0xff]  ;;  %v2213_v22 = vld [vmem:[#allocation2 + $0x148] sm:$0xff]  ;;  %v2215_v23 = vld [vmem:[#allocation2 + $0x158] sm:$0xff] }
  0x23   : > { %354 = vmatpush1.msra.mxu1 %v2185_v13  ;;  %284 = vmatprep.subr.mxu0 %v2189_v14  ;;  %v2219_v24 = vld [vmem:[#allocation2 + $0x140] sm:$0xff]  ;;  %v2221_v25 = vld [vmem:[#allocation2 + $0x150] sm:$0xff]  ;;  %v2225_v26 = vld [vmem:[#allocation2 + $0x128] sm:$0xff] }
  0x24   : > { %355 = vmatprep.subr.mxu1 %v2191_v15  ;;  %285 = vmatpush1.msra.mxu0 %v2195_v16  ;;  %v2227_v27 = vld [vmem:[#allocation2 + $0x138] sm:$0xff]  ;;  %v2231_v28 = vld [vmem:[#allocation2 + $0x120] sm:$0xff]  ;;  %v2233_v29 = vld [vmem:[#allocation2 + $0x130] sm:$0xff] }
  0x25   : > { %356 = vmatpush1.msra.mxu1 %v2197_v17  ;;  %286 = vmatprep.subr.mxu0 %v2201_v18  ;;  %v2237_v30 = vld [vmem:[#allocation2 + $0x108] sm:$0xff]  ;;  %v2239_v31 = vld [vmem:[#allocation2 + $0x118] sm:$0xff]  ;;  %v2243_v32 = vld [vmem:[#allocation2 + $0x100] sm:$0xff] }
  0x26   : > { %357 = vmatprep.subr.mxu1 %v2203_v19  ;;  %287 = vmatpush1.msra.mxu0 %v2207_v20  ;;  %v2245_v33 = vld [vmem:[#allocation2 + $0x110] sm:$0xff]  ;;  %v2249_v34 = vld [vmem:[#allocation2 + $0xe8] sm:$0xff]  ;;  %v2251_v35 = vld [vmem:[#allocation2 + $0xf8] sm:$0xff] }
  0x27   : > { %358 = vmatpush1.msra.mxu1 %v2209_v21  ;;  %288 = vmatprep.subr.mxu0 %v2213_v22  ;;  %v2255_v36 = vld [vmem:[#allocation2 + $0xe0] sm:$0xff]  ;;  %v2257_v37 = vld [vmem:[#allocation2 + $0xf0] sm:$0xff]  ;;  %v2261_v38 = vld [vmem:[#allocation2 + $0xc8] sm:$0xff] }
  0x28   : > { %359 = vmatprep.subr.mxu1 %v2215_v23  ;;  %289 = vmatpush1.msra.mxu0 %v2219_v24  ;;  %v2263_v39 = vld [vmem:[#allocation2 + $0xd8] sm:$0xff]  ;;  %v2267_v40 = vld [vmem:[#allocation2 + $0xc0] sm:$0xff]  ;;  %v2269_v41 = vld [vmem:[#allocation2 + $0xd0] sm:$0xff] }
  0x29   : > { %360 = vmatpush1.msra.mxu1 %v2221_v25  ;;  %290 = vmatprep.subr.mxu0 %v2225_v26  ;;  %v2274_v42 = vld [vmem:[#allocation2 + $0xa8] sm:$0xff]  ;;  %v2276_v43 = vld [vmem:[#allocation2 + $0xb8] sm:$0xff]  ;;  %v2280_v44 = vld [vmem:[#allocation2 + $0xa0] sm:$0xff] }
  0x2a   : > { %361 = vmatprep.subr.mxu1 %v2227_v27  ;;  %291 = vmatpush1.msra.mxu0 %v2231_v28  ;;  %3204 = vst [vmem:[#allocation7_spill] sm:$0xff] %v2280_v44  ;;  %v2282_v45 = vld [vmem:[#allocation2 + $0xb0] sm:$0xff]  ;;  %v2286_v46 = vld [vmem:[#allocation2 + $0x88] sm:$0xff]  ;;  %v2288_v47 = vld [vmem:[#allocation2 + $0x98] sm:$0xff] }
  0x2b   : > { %362 = vmatpush1.msra.mxu1 %v2233_v29  ;;  %292 = vmatprep.subr.mxu0 %v2237_v30  ;;  %3205 = vst [vmem:[#allocation8_spill] sm:$0xff] %v2282_v45  ;;  %3206 = vst [vmem:[#allocation9_spill] sm:$0xff] %v2286_v46  ;;  %v2292_v48 = vld [vmem:[#allocation2 + $0x80] sm:$0xff]  ;;  %v2294_v49 = vld [vmem:[#allocation2 + $0x90] sm:$0xff] }
  0x2c   : > { %363 = vmatprep.subr.mxu1 %v2239_v31  ;;  %293 = vmatpush1.msra.mxu0 %v2243_v32  ;;  %3207 = vst [vmem:[#allocation10_spill] sm:$0xff] %v2288_v47  ;;  %3208 = vst [vmem:[#allocation11_spill] sm:$0xff] %v2292_v48  ;;  %v2303_v50 = vld [vmem:[#allocation2 + $0x68] sm:$0xff]  ;;  %v2305_v51 = vld [vmem:[#allocation2 + $0x78] sm:$0xff] }
  0x2d   : > { %364 = vmatpush1.msra.mxu1 %v2245_v33  ;;  %294 = vmatprep.subr.mxu0 %v2249_v34  ;;  %3209 = vst [vmem:[#allocation12_spill] sm:$0xff] %v2294_v49  ;;  %3210 = vst [vmem:[#allocation13_spill] sm:$0xff] %v2303_v50  ;;  %v2309_v52 = vld [vmem:[#allocation2 + $0x60] sm:$0xff]  ;;  %v2311_v53 = vld [vmem:[#allocation2 + $0x70] sm:$0xff] }
  0x2e   : > { %365 = vmatprep.subr.mxu1 %v2251_v35  ;;  %295 = vmatpush1.msra.mxu0 %v2255_v36  ;;  %3211 = vst [vmem:[#allocation14_spill] sm:$0xff] %v2305_v51  ;;  %3212 = vst [vmem:[#allocation15_spill] sm:$0xff] %v2309_v52  ;;  %v2315_v54 = vld [vmem:[#allocation2 + $0x48] sm:$0xff]  ;;  %v2317_v55 = vld [vmem:[#allocation2 + $0x58] sm:$0xff] }
  0x2f   : > { %366 = vmatpush1.msra.mxu1 %v2257_v37  ;;  %296 = vmatprep.subr.mxu0 %v2261_v38  ;;  %3213 = vst [vmem:[#allocation16_spill] sm:$0xff] %v2311_v53  ;;  %3214 = vst [vmem:[#allocation17_spill] sm:$0xff] %v2315_v54  ;;  %v2321_v56 = vld [vmem:[#allocation2 + $0x40] sm:$0xff]  ;;  %v2323_v57 = vld [vmem:[#allocation2 + $0x50] sm:$0xff] }
  0x30   : > { %367 = vmatprep.subr.mxu1 %v2263_v39  ;;  %297 = vmatpush1.msra.mxu0 %v2267_v40  ;;  %3215 = vst [vmem:[#allocation18_spill] sm:$0xff] %v2317_v55  ;;  %3216 = vst [vmem:[#allocation19_spill] sm:$0xff] %v2321_v56  ;;  %v2328_v58 = vld [vmem:[#allocation2 + $0x28] sm:$0xff]  ;;  %v2330_v59 = vld [vmem:[#allocation2 + $0x38] sm:$0xff] }
  0x31   : > { %368 = vmatpush1.msra.mxu1 %v2269_v41  ;;  %298 = vmatprep.subr.mxu0 %v2274_v42  ;;  %3217 = vst [vmem:[#allocation20_spill] sm:$0xff] %v2323_v57  ;;  %3218 = vst [vmem:[#allocation21_spill] sm:$0xff] %v2328_v58  ;;  %v2334_v60 = vld [vmem:[#allocation2 + $0x20] sm:$0xff]  ;;  %v2336_v61 = vld [vmem:[#allocation2 + $0x30] sm:$0xff] }
  0x32   : > { %369 = vmatprep.subr.mxu1 %v2276_v43  ;;  %299 = vmatpush1.msra.mxu0 %v2280_v44  ;;  %3219 = vst [vmem:[#allocation22_spill] sm:$0xff] %v2330_v59  ;;  %3220 = vst [vmem:[#allocation23_spill] sm:$0xff] %v2334_v60  ;;  %v2340_v62 = vld [vmem:[#allocation2 + $0x8] sm:$0xff]  ;;  %v2342_v63 = vld [vmem:[#allocation2 + $0x18] sm:$0xff] }
  0x33   : > { %370 = vmatpush1.msra.mxu1 %v2282_v45  ;;  %300 = vmatprep.subr.mxu0 %v2286_v46  ;;  %3221 = vst [vmem:[#allocation24_spill] sm:$0xff] %v2336_v61  ;;  %3222 = vst [vmem:[#allocation25_spill] sm:$0xff] %v2340_v62  ;;  %v2353_v1 = vld [vmem:[#allocation2] sm:$0xff]  ;;  %v2355_v0 = vld [vmem:[#allocation2 + $0x10] sm:$0xff] }
  0x34   : > { %371 = vmatprep.subr.mxu1 %v2288_v47  ;;  %301 = vmatpush1.msra.mxu0 %v2292_v48  ;;  %3223 = vst [vmem:[#allocation26_spill] sm:$0xff] %v2342_v63  ;;  %3224 = vst [vmem:[#allocation27_spill] sm:$0xff] %v2353_v1 }
  0x35   : > { %372 = vmatpush1.msra.mxu1 %v2294_v49  ;;  %302 = vmatprep.subr.mxu0 %v2303_v50  ;;  %3225 = vst [vmem:[#allocation28_spill] sm:$0xff] %v2355_v0 }
  0x36   : > { %373 = vmatprep.subr.mxu1 %v2305_v51  ;;  %303 = vmatpush1.msra.mxu0 %v2309_v52 }
  0x37   : > { %374 = vmatpush1.msra.mxu1 %v2311_v53  ;;  %304 = vmatprep.subr.mxu0 %v2315_v54 }
  0x38   : > { %375 = vmatprep.subr.mxu1 %v2317_v55  ;;  %305 = vmatpush1.msra.mxu0 %v2321_v56 }
  0x39   : > { %376 = vmatpush1.msra.mxu1 %v2323_v57  ;;  %306 = vmatprep.subr.mxu0 %v2328_v58  ;;  %v2362_v57 = vld [vmem:[%s2349_s22] sm:$0xff]  ;;  %v3227_v58 = vmov 0.0  }
  0x3a   : > { %377 = vmatprep.subr.mxu1 %v2330_v59  ;;  %307 = vmatpush1.msra.mxu0 %v2334_v60  ;;  %3226 = vst [vmem:[#allocation29_spill] sm:$0xff] %v2362_v57 }
  0x3b   : > { %378 = vmatpush1.msra.mxu1 %v2336_v61  ;;  %308 = vmatprep.subr.mxu0 %v2340_v62 }
  0x3c   : > { %379 = vmatprep.subr.mxu1 %v2342_v63  ;;  %309 = vmatpush1.msra.mxu0 %v2353_v1 }
  0x3d   : > { %380 = vmatpush1.msra.mxu1 %v2355_v0  ;;  %343 = vmatmul.mubr.f32.vlgmr.msra.gmra.mxu0 %v3227_v58 }
  0x3e   : > { %414 = vmatmul.mubr.f32.vlgmr.msra.gmra.mxu1 %v3227_v58  ;;  %225 = vperm.xlu0 %1860, %v2362_v57  }
  0x3f   : > { %460 = vmatprep.subr.mxu0 %v2157_v2  ;;  %531 = vmatprep.subr.mxu1 %v2159_v3 }
  0x40   : > { %461 = vmatpush1.msra.mxu0 %v2161_v4  ;;  %532 = vmatpush1.msra.mxu1 %v2165_v5 }
  0x41   : > { %462 = vmatprep.subr.mxu0 %v2167_v6  ;;  %533 = vmatprep.subr.mxu1 %v2169_v7 }
  0x42   : > { %463 = vmatpush1.msra.mxu0 %v2173_v8  ;;  %534 = vmatpush1.msra.mxu1 %v2175_v9 }
  0x43   : > { %464 = vmatprep.subr.mxu0 %v2177_v10  ;;  %535 = vmatprep.subr.mxu1 %v2181_v11 }
  0x44   : > { %465 = vmatpush1.msra.mxu0 %v2183_v12  ;;  %536 = vmatpush1.msra.mxu1 %v2185_v13 }
  0x45   : > { %466 = vmatprep.subr.mxu0 %v2189_v14  ;;  %537 = vmatprep.subr.mxu1 %v2191_v15 }
  0x46   : > { %467 = vmatpush1.msra.mxu0 %v2195_v16  ;;  %538 = vmatpush1.msra.mxu1 %v2197_v17 }
  0x47   : > { %468 = vmatprep.subr.mxu0 %v2201_v18  ;;  %539 = vmatprep.subr.mxu1 %v2203_v19 }
  0x48   : > { %469 = vmatpush1.msra.mxu0 %v2207_v20  ;;  %540 = vmatpush1.msra.mxu1 %v2209_v21 }
  0x49   : > { %470 = vmatprep.subr.mxu0 %v2213_v22  ;;  %541 = vmatprep.subr.mxu1 %v2215_v23 }
  0x4a   : > { %471 = vmatpush1.msra.mxu0 %v2219_v24  ;;  %542 = vmatpush1.msra.mxu1 %v2221_v25 }
  0x4b   : > { %472 = vmatprep.subr.mxu0 %v2225_v26  ;;  %543 = vmatprep.subr.mxu1 %v2227_v27 }
  0x4c   : > { %473 = vmatpush1.msra.mxu0 %v2231_v28  ;;  %544 = vmatpush1.msra.mxu1 %v2233_v29 }
  0x4d   : > { %474 = vmatprep.subr.mxu0 %v2237_v30  ;;  %545 = vmatprep.subr.mxu1 %v2239_v31 }
  0x4e   : > { %475 = vmatpush1.msra.mxu0 %v2243_v32  ;;  %546 = vmatpush1.msra.mxu1 %v2245_v33 }
  0x4f   : > { %476 = vmatprep.subr.mxu0 %v2249_v34  ;;  %547 = vmatprep.subr.mxu1 %v2251_v35 }
  0x50   : > { %477 = vmatpush1.msra.mxu0 %v2255_v36  ;;  %548 = vmatpush1.msra.mxu1 %v2257_v37 }
  0x51   : > { %478 = vmatprep.subr.mxu0 %v2261_v38  ;;  %549 = vmatprep.subr.mxu1 %v2263_v39 }
  0x52   : > { %479 = vmatpush1.msra.mxu0 %v2267_v40  ;;  %550 = vmatpush1.msra.mxu1 %v2269_v41 }
  0x53   : > { %480 = vmatprep.subr.mxu0 %v2274_v42  ;;  %551 = vmatprep.subr.mxu1 %v2276_v43 }
  0x54   : > { %481 = vmatpush1.msra.mxu0 %v2280_v44  ;;  %552 = vmatpush1.msra.mxu1 %v2282_v45 }
  0x55   : > { %482 = vmatprep.subr.mxu0 %v2286_v46  ;;  %553 = vmatprep.subr.mxu1 %v2288_v47  ;;  %v3228_v46 = vld [vmem:[#allocation20_spill] sm:$0xff]  ;;  %v3229_v47 = vld [vmem:[#allocation21_spill] sm:$0xff] }
  0x56   : > { %483 = vmatpush1.msra.mxu0 %v2292_v48  ;;  %554 = vmatpush1.msra.mxu1 %v2294_v49 }
  0x57   : > { %484 = vmatprep.subr.mxu0 %v2303_v50  ;;  %555 = vmatprep.subr.mxu1 %v2305_v51 }
  0x58   : > { %485 = vmatpush1.msra.mxu0 %v2309_v52  ;;  %556 = vmatpush1.msra.mxu1 %v2311_v53 }
  0x59   : > { %486 = vmatprep.subr.mxu0 %v2315_v54  ;;  %557 = vmatprep.subr.mxu1 %v2317_v55 }
  0x5a   : > { %487 = vmatpush1.msra.mxu0 %v2321_v56  ;;  %558 = vmatpush1.msra.mxu1 %v3228_v46  ;;  %v221_v56 = vld [vmem:[#allocation2 + $0x201] ss:$8 sm:$0xf] }
  0x5b   : > { %488 = vmatprep.subr.mxu0 %v3229_v47  ;;  %559 = vmatprep.subr.mxu1 %v2330_v59  ;;  %v2105_v59 = vmov 1  }
  0x5c   : > { %489 = vmatpush1.msra.mxu0 %v2334_v60  ;;  %560 = vmatpush1.msra.mxu1 %v2336_v61  ;;  %v229_v61 = vlaneseq }
  0x5d   : > { %490 = vmatprep.subr.mxu0 %v2340_v62  ;;  %561 = vmatprep.subr.mxu1 %v2342_v63  ;;  %v219_v63 = vld [vmem:[#allocation2 + $0x200] ss:$8 sm:$0xf] }
  0x5e   : > { %491 = vmatpush1.msra.mxu0 %v2353_v1  ;;  %524 = vmatprep.mubr.f32.mxu0 %v3227_v58  ;;  %v230_v62 = vshrl.u32 %v229_v61, 7 }
  0x5f   : > { %562 = vmatpush1.msra.mxu1 %v2355_v0  ;;  %595 = vmatprep.mubr.f32.mxu1 %v3227_v58 }
  0x60   : > { %642 = vmatprep.subr.mxu0 %v2157_v2  ;;  %713 = vmatprep.subr.mxu1 %v2159_v3  ;;  %v231_v60 = vsub.s32 0, %v230_v62  ;;  %v235_v47 = vsub.s32 1, %v230_v62  ;;  %v239_v51 = vsub.s32 2, %v230_v62 }
  0x61   : > { %1861 = vset.pattern.permute.xlu0 %v2105_v59 }
  0x62   : > { %449 = vperm.xlu0 %1861, %v2362_v57   ;;  %v2438_v1 = vrot.slane %v219_v63, %v231_v60  ;;  %v2440_v0 = vrot.slane %v219_v63, %v235_v47  ;;  %v2443_v2 = vrot.slane %v221_v56, %v231_v60  ;;  %v2446_v59 = vrot.slane %v221_v56, %v235_v47 }
  0x63   : > { %v243_v57 = vsub.s32 3, %v230_v62  ;;  %v2455_v45 = vrot.slane %v219_v63, %v239_v51 }
  0x64   : > { %3230 = vst [vmem:[#allocation30_spill] sm:$0xff] %v2438_v1  ;;  %3231 = vst [vmem:[#allocation31_spill] sm:$0xff] %v2440_v0 }
  0x65   : > { %3232 = vst [vmem:[#allocation32_spill] sm:$0xff] %v2446_v59  ;;  %v2450_v53 = vrot.slane %v219_v63, %v243_v57 }
  0xb9   : > { %v226_v46 = vpop.permute.xlu0 %225 }
  0xba   : > { %v249_v58 = vmul.f32 %v2438_v1, %v226_v46  ;;  %v250_v3 = vmul.f32 %v2440_v0, %v226_v46  ;;  %v252_v60 = vmul.f32 %v2450_v53, %v226_v46  ;;  %v2453_v1 = vrot.slane %v221_v56, %v243_v57 }
  0xbc   : > { %v274_v61 = vadd.f32 %v2443_v2, %v249_v58  ;;  %v275_v55 = vadd.f32 %v2446_v59, %v250_v3  ;;  %3233 = vst [vmem:[#allocation33_spill] sm:$0xff] %v2453_v1  ;;  %v277_v3 = vadd.f32 %v2453_v1, %v252_v60  ;;  %v251_v59 = vmul.f32 %v2455_v45, %v226_v46 }
  0xfd   : > { %v344_v54 = vpop.f32.mrf.mxu0 }
  0xfe   : > { %v420_v52 = vadd.f32 %v344_v54, %v274_v61  ;;  %v415_v47 = vpop.f32.mrf.mxu1  ;;  %v2459_v54 = vrot.slane %v221_v56, %v239_v51 }
  0xff   : > { %v346_v50 = vpop.f32.mrf.mxu0 }
 0x100   : > { %v1804_v49 = vmul.f32 -1.442695, %v420_v52  ;;  %v421_v48 = vadd.f32 %v346_v50, %v275_v55  ;;  %v417_v58 = vpop.f32.mrf.mxu1  ;;  %v276_v50 = vadd.f32 %v2459_v54, %v251_v59 }
 0x101   : > { %v423_v62 = vadd.f32 %v417_v58, %v277_v3 }
 0x102   : > { %1869 = vpow2.f32 %v1804_v49  ;;  %v1805_v0 = vmul.f32 -1.442695, %v421_v48  ;;  %v422_v57 = vadd.f32 %v415_v47, %v276_v50  ;;  %v3236_v50 = vld [vmem:[#allocation10_spill] sm:$0xff] }
 0x103   : > { %v1806_v52 = vmul.f32 -1.442695, %v423_v62  ;;  %v3235_v62 = vld [vmem:[#allocation9_spill] sm:$0xff] }
 0x104   : > { %1871 = vpow2.f32 %v1805_v0 }
 0x105   : > { %1873 = vpow2.f32 %v1806_v52  ;;  %v3237_v52 = vld [vmem:[#allocation11_spill] sm:$0xff] }
 0x10f   : > { %v1870_v55 = vpop.eup %1869 }
 0x110   : > { %v427_v61 = vadd.f32 1.0, %v1870_v55  ;;  %v3238_v55 = vld [vmem:[#allocation12_spill] sm:$0xff] }
 0x111   : > { %v1872_v49 = vpop.eup %1871 }
 0x112   : > { %1875 = vrcp.f32 %v427_v61  ;;  %v433_v48 = vadd.f32 1.0, %v1872_v49  ;;  %v1874_v0 = vpop.eup %1873  ;;  %v3240_v61 = vld [vmem:[#allocation14_spill] sm:$0xff]  ;;  %v3241_v49 = vld [vmem:[#allocation15_spill] sm:$0xff] }
 0x113   : > { %1877 = vtanh.f32 %v422_v57  ;;  %v440_v46 = vadd.f32 1.0, %v1874_v0  ;;  %v3239_v57 = vld [vmem:[#allocation13_spill] sm:$0xff] }
 0x114   : > { %1879 = vrcp.f32 %v433_v48  ;;  %v3242_v48 = vld [vmem:[#allocation16_spill] sm:$0xff]  ;;  %v3243_v0 = vld [vmem:[#allocation17_spill] sm:$0xff] }
 0x115   : > { %1881 = vrcp.f32 %v440_v46  ;;  %v3246_v46 = vld [vmem:[#allocation20_spill] sm:$0xff] }
 0x11f   : > { %v1876_v63 = vpop.eup %1875 }
 0x120   : > { %v1878_v60 = vpop.eup %1877 }
 0x121   : > { %v1880_v1 = vpop.eup %1879  ;;  %v444_v56 = vmul.f32 %v1878_v60, %v1876_v63  ;;  %v3244_v63 = vld [vmem:[#allocation18_spill] sm:$0xff]  ;;  %v3245_v60 = vld [vmem:[#allocation19_spill] sm:$0xff] }
 0x122   : > { %v443_v51 = vmul.f32 0.0, %v1880_v1  ;;  %v1882_v59 = vpop.eup %1881  ;;  %v3234_v1 = vld [vmem:[#allocation8_spill] sm:$0xff] }
 0x124   : > { %v2462_v3 = vadd.f32 %v444_v56, %v443_v51  ;;  %v3247_v51 = vld [vmem:[#allocation21_spill] sm:$0xff]  ;;  %v3248_v56 = vld [vmem:[#allocation22_spill] sm:$0xff] }
 0x126   : > { %1883 = vtanh.f32 %v2462_v3 }
 0x133   : > { %v1884_v47 = vpop.eup %1883 }
 0x134   : > { %v447_v58 = vmul.f32 %v1884_v47, %v1882_v59  ;;  %v3249_v59 = vld [vmem:[#allocation23_spill] sm:$0xff]  ;;  %v3250_v47 = vld [vmem:[#allocation24_spill] sm:$0xff] }
 0x136   : > { %525 = vmatmul.mubr.f32.vlgmr.msra.gmra.mxu0 %v447_v58  ;;  %596 = vmatmul.mubr.f32.vlgmr.msra.gmra.mxu1 %v447_v58  ;;  %v3251_v58 = vld [vmem:[#allocation25_spill] sm:$0xff] }
 0x137   : > { %643 = vmatpush1.msra.mxu0 %v2161_v4  ;;  %714 = vmatpush1.msra.mxu1 %v2165_v5 }
 0x138   : > { %644 = vmatprep.subr.mxu0 %v2167_v6  ;;  %715 = vmatprep.subr.mxu1 %v2169_v7 }
 0x139   : > { %645 = vmatpush1.msra.mxu0 %v2173_v8  ;;  %716 = vmatpush1.msra.mxu1 %v2175_v9 }
 0x13a   : > { %646 = vmatprep.subr.mxu0 %v2177_v10  ;;  %717 = vmatprep.subr.mxu1 %v2181_v11 }
 0x13b   : > { %647 = vmatpush1.msra.mxu0 %v2183_v12  ;;  %718 = vmatpush1.msra.mxu1 %v2185_v13 }
 0x13c   : > { %648 = vmatprep.subr.mxu0 %v2189_v14  ;;  %719 = vmatprep.subr.mxu1 %v2191_v15 }
 0x13d   : > { %649 = vmatpush1.msra.mxu0 %v2195_v16  ;;  %720 = vmatpush1.msra.mxu1 %v2197_v17 }
 0x13e   : > { %650 = vmatprep.subr.mxu0 %v2201_v18  ;;  %721 = vmatprep.subr.mxu1 %v2203_v19 }
 0x13f   : > { %651 = vmatpush1.msra.mxu0 %v2207_v20  ;;  %722 = vmatpush1.msra.mxu1 %v2209_v21 }
 0x140   : > { %652 = vmatprep.subr.mxu0 %v2213_v22  ;;  %723 = vmatprep.subr.mxu1 %v2215_v23 }
 0x141   : > { %653 = vmatpush1.msra.mxu0 %v2219_v24  ;;  %724 = vmatpush1.msra.mxu1 %v2221_v25 }
 0x142   : > { %654 = vmatprep.subr.mxu0 %v2225_v26  ;;  %725 = vmatprep.subr.mxu1 %v2227_v27 }
 0x143   : > { %655 = vmatpush1.msra.mxu0 %v2231_v28  ;;  %726 = vmatpush1.msra.mxu1 %v2233_v29 }
 0x144   : > { %656 = vmatprep.subr.mxu0 %v2237_v30  ;;  %727 = vmatprep.subr.mxu1 %v2239_v31 }
 0x145   : > { %657 = vmatpush1.msra.mxu0 %v2243_v32  ;;  %728 = vmatpush1.msra.mxu1 %v2245_v33 }
 0x146   : > { %658 = vmatprep.subr.mxu0 %v2249_v34  ;;  %729 = vmatprep.subr.mxu1 %v2251_v35 }
 0x147   : > { %659 = vmatpush1.msra.mxu0 %v2255_v36  ;;  %730 = vmatpush1.msra.mxu1 %v2257_v37 }
 0x148   : > { %660 = vmatprep.subr.mxu0 %v2261_v38  ;;  %731 = vmatprep.subr.mxu1 %v2263_v39 }
 0x149   : > { %661 = vmatpush1.msra.mxu0 %v2267_v40  ;;  %732 = vmatpush1.msra.mxu1 %v2269_v41 }
 0x14a   : > { %662 = vmatprep.subr.mxu0 %v2274_v42  ;;  %733 = vmatprep.subr.mxu1 %v2276_v43 }
 0x14b   : > { %663 = vmatpush1.msra.mxu0 %v2280_v44  ;;  %734 = vmatpush1.msra.mxu1 %v3234_v1 }
 0x14c   : > { %664 = vmatprep.subr.mxu0 %v3235_v62  ;;  %735 = vmatprep.subr.mxu1 %v3236_v50 }
 0x14d   : > { %665 = vmatpush1.msra.mxu0 %v3237_v52  ;;  %736 = vmatpush1.msra.mxu1 %v3238_v55 }
 0x14e   : > { %666 = vmatprep.subr.mxu0 %v3239_v57  ;;  %737 = vmatprep.subr.mxu1 %v3240_v61  ;;  %v3261_v57 = vld [vmem:[#allocation32_spill] sm:$0xff] }
 0x14f   : > { %667 = vmatpush1.msra.mxu0 %v3241_v49  ;;  %738 = vmatpush1.msra.mxu1 %v3242_v48  ;;  %v3252_v49 = vld [vmem:[#allocation26_spill] sm:$0xff]  ;;  %v3253_v48 = vld [vmem:[#allocation27_spill] sm:$0xff] }
 0x150   : > { %668 = vmatprep.subr.mxu0 %v3243_v0  ;;  %739 = vmatprep.subr.mxu1 %v3244_v63  ;;  %v3254_v0 = vmov 0.0   ;;  %v3255_v63 = vld [vmem:[#allocation28_spill] sm:$0xff] }
 0x151   : > { %669 = vmatpush1.msra.mxu0 %v3245_v60  ;;  %740 = vmatpush1.msra.mxu1 %v3246_v46  ;;  %v3256_v46 = vld [vmem:[#allocation5_spill] sm:$0xff] }
 0x152   : > { %670 = vmatprep.subr.mxu0 %v3247_v51  ;;  %741 = vmatprep.subr.mxu1 %v3248_v56  ;;  %v3257_v51 = vld [vmem:[#allocation6_spill] sm:$0xff]  ;;  %v2106_v56 = vmov 2  }
 0x153   : > { %671 = vmatpush1.msra.mxu0 %v3249_v59  ;;  %742 = vmatpush1.msra.mxu1 %v3250_v47  ;;  %v3258_v59 = vld [vmem:[#allocation29_spill] sm:$0xff]  ;;  %v450_v47 = vpop.permute.xlu0 %449 }
 0x154   : > { %672 = vmatprep.subr.mxu0 %v3251_v58  ;;  %743 = vmatprep.subr.mxu1 %v3252_v49  ;;  %v3259_v58 = vld [vmem:[#allocation30_spill] sm:$0xff]  ;;  %v3260_v49 = vld [vmem:[#allocation31_spill] sm:$0xff] }
 0x155   : > { %673 = vmatpush1.msra.mxu0 %v3253_v48  ;;  %706 = vmatprep.mubr.f32.mxu0 %v3254_v0  ;;  %v452_v60 = vmul.f32 %v450_v47, %v3259_v58  ;;  %v453_v61 = vmul.f32 %v450_v47, %v3260_v49  ;;  %v454_v49 = vmul.f32 %v450_v47, %v2455_v45 }
 0x156   : > { %744 = vmatpush1.msra.mxu1 %v3255_v63  ;;  %777 = vmatprep.mubr.f32.mxu1 %v3254_v0 }
 0x157   : > { %824 = vmatprep.subr.mxu0 %v3256_v46  ;;  %895 = vmatprep.subr.mxu1 %v3257_v51  ;;  %v456_v48 = vadd.f32 %v452_v60, %v2443_v2  ;;  %v457_v55 = vadd.f32 %v453_v61, %v3261_v57  ;;  %v455_v51 = vmul.f32 %v450_v47, %v2450_v53 }
 0x158   : > { %1862 = vset.pattern.permute.xlu1 %v2106_v56  ;;  %v458_v60 = vadd.f32 %v454_v49, %v2459_v54 }
 0x159   : > { %631 = vperm.xlu1 %1862, %v3258_v59   ;;  %v3262_v59 = vld [vmem:[#allocation33_spill] sm:$0xff] }
 0x15a   : > { %v459_v1 = vadd.f32 %v455_v51, %v3262_v59 }
 0x1f6   : > { %v526_v63 = vpop.f32.mrf.mxu0  ;;  %v597_v56 = vpop.f32.mrf.mxu1 }
 0x1f7   : > { %v602_v52 = vadd.f32 %v526_v63, %v456_v48  ;;  %v604_v48 = vadd.f32 %v597_v56, %v458_v60  ;;  %v3266_v56 = vld [vmem:[#allocation10_spill] sm:$0xff]  ;;  %v3267_v60 = vld [vmem:[#allocation11_spill] sm:$0xff] }
 0x1f8   : > { %v528_v0 = vpop.f32.mrf.mxu0  ;;  %v599_v58 = vpop.f32.mrf.mxu1 }
 0x1f9   : > { %v1807_v50 = vmul.f32 -1.442695, %v602_v52  ;;  %v603_v46 = vadd.f32 %v528_v0, %v457_v55  ;;  %v605_v44 = vadd.f32 %v599_v58, %v459_v1  ;;  %v3265_v58 = vld [vmem:[#allocation9_spill] sm:$0xff] }
 0x1fb   : > { %1885 = vpow2.f32 %v1807_v50  ;;  %v1808_v62 = vmul.f32 -1.442695, %v603_v46  ;;  %v1809_v61 = vmul.f32 -1.442695, %v605_v44 }
 0x1fd   : > { %1887 = vpow2.f32 %v1808_v62 }
 0x1fe   : > { %1889 = vpow2.f32 %v1809_v61  ;;  %v3268_v61 = vld [vmem:[#allocation12_spill] sm:$0xff] }
 0x208   : > { %v1886_v57 = vpop.eup %1885 }
 0x209   : > { %v609_v63 = vadd.f32 1.0, %v1886_v57 }
 0x20a   : > { %v1888_v52 = vpop.eup %1887 }
 0x20b   : > { %1891 = vrcp.f32 %v609_v63  ;;  %v615_v55 = vadd.f32 1.0, %v1888_v52  ;;  %v1890_v50 = vpop.eup %1889  ;;  %v3270_v63 = vld [vmem:[#allocation14_spill] sm:$0xff]  ;;  %v3271_v52 = vld [vmem:[#allocation15_spill] sm:$0xff] }
 0x20c   : > { %1893 = vtanh.f32 %v604_v48  ;;  %v622_v51 = vadd.f32 1.0, %v1890_v50  ;;  %v3269_v48 = vld [vmem:[#allocation13_spill] sm:$0xff] }
 0x20d   : > { %1895 = vrcp.f32 %v615_v55  ;;  %v3272_v55 = vld [vmem:[#allocation16_spill] sm:$0xff]  ;;  %v3273_v50 = vld [vmem:[#allocation17_spill] sm:$0xff] }
 0x20e   : > { %1897 = vrcp.f32 %v622_v51  ;;  %v3277_v51 = vld [vmem:[#allocation21_spill] sm:$0xff] }
 0x218   : > { %v1892_v62 = vpop.eup %1891 }
 0x219   : > { %v1894_v0 = vpop.eup %1893 }
 0x21a   : > { %v1896_v46 = vpop.eup %1895  ;;  %v626_v59 = vmul.f32 %v1894_v0, %v1892_v62  ;;  %v3274_v62 = vld [vmem:[#allocation18_spill] sm:$0xff]  ;;  %v3275_v0 = vld [vmem:[#allocation19_spill] sm:$0xff] }
 0x21b   : > { %v625_v1 = vmul.f32 %v1896_v46, %v2462_v3  ;;  %v1898_v44 = vpop.eup %1897  ;;  %v3263_v3 = vld [vmem:[#allocation7_spill] sm:$0xff]  ;;  %v3276_v46 = vld [vmem:[#allocation20_spill] sm:$0xff] }
 0x21d   : > { %v2541_v47 = vadd.f32 %v626_v59, %v625_v1  ;;  %v3264_v59 = vld [vmem:[#allocation8_spill] sm:$0xff]  ;;  %v3278_v1 = vld [vmem:[#allocation22_spill] sm:$0xff] }
 0x21f   : > { %1899 = vtanh.f32 %v2541_v47 }
 0x22c   : > { %v1900_v57 = vpop.eup %1899 }
 0x22d   : > { %v629_v49 = vmul.f32 %v1900_v57, %v1898_v44  ;;  %v3279_v44 = vld [vmem:[#allocation23_spill] sm:$0xff]  ;;  %v3280_v57 = vld [vmem:[#allocation24_spill] sm:$0xff] }
 0x22f   : > { %707 = vmatmul.mubr.f32.vlgmr.msra.gmra.mxu0 %v629_v49  ;;  %778 = vmatmul.mubr.f32.vlgmr.msra.gmra.mxu1 %v629_v49  ;;  %v3281_v49 = vld [vmem:[#allocation25_spill] sm:$0xff] }
 0x230   : > { %825 = vmatpush1.msra.mxu0 %v2161_v4  ;;  %896 = vmatpush1.msra.mxu1 %v2165_v5 }
 0x231   : > { %826 = vmatprep.subr.mxu0 %v2167_v6  ;;  %897 = vmatprep.subr.mxu1 %v2169_v7 }
 0x232   : > { %827 = vmatpush1.msra.mxu0 %v2173_v8  ;;  %898 = vmatpush1.msra.mxu1 %v2175_v9 }
 0x233   : > { %828 = vmatprep.subr.mxu0 %v2177_v10  ;;  %899 = vmatprep.subr.mxu1 %v2181_v11 }
 0x234   : > { %829 = vmatpush1.msra.mxu0 %v2183_v12  ;;  %900 = vmatpush1.msra.mxu1 %v2185_v13 }
 0x235   : > { %830 = vmatprep.subr.mxu0 %v2189_v14  ;;  %901 = vmatprep.subr.mxu1 %v2191_v15 }
 0x236   : > { %831 = vmatpush1.msra.mxu0 %v2195_v16  ;;  %902 = vmatpush1.msra.mxu1 %v2197_v17 }
 0x237   : > { %832 = vmatprep.subr.mxu0 %v2201_v18  ;;  %903 = vmatprep.subr.mxu1 %v2203_v19 }
 0x238   : > { %833 = vmatpush1.msra.mxu0 %v2207_v20  ;;  %904 = vmatpush1.msra.mxu1 %v2209_v21 }
 0x239   : > { %834 = vmatprep.subr.mxu0 %v2213_v22  ;;  %905 = vmatprep.subr.mxu1 %v2215_v23 }
 0x23a   : > { %835 = vmatpush1.msra.mxu0 %v2219_v24  ;;  %906 = vmatpush1.msra.mxu1 %v2221_v25 }
 0x23b   : > { %836 = vmatprep.subr.mxu0 %v2225_v26  ;;  %907 = vmatprep.subr.mxu1 %v2227_v27 }
 0x23c   : > { %837 = vmatpush1.msra.mxu0 %v2231_v28  ;;  %908 = vmatpush1.msra.mxu1 %v2233_v29 }
 0x23d   : > { %838 = vmatprep.subr.mxu0 %v2237_v30  ;;  %909 = vmatprep.subr.mxu1 %v2239_v31 }
 0x23e   : > { %839 = vmatpush1.msra.mxu0 %v2243_v32  ;;  %910 = vmatpush1.msra.mxu1 %v2245_v33 }
 0x23f   : > { %840 = vmatprep.subr.mxu0 %v2249_v34  ;;  %911 = vmatprep.subr.mxu1 %v2251_v35 }
 0x240   : > { %841 = vmatpush1.msra.mxu0 %v2255_v36  ;;  %912 = vmatpush1.msra.mxu1 %v2257_v37 }
 0x241   : > { %842 = vmatprep.subr.mxu0 %v2261_v38  ;;  %913 = vmatprep.subr.mxu1 %v2263_v39 }
 0x242   : > { %843 = vmatpush1.msra.mxu0 %v2267_v40  ;;  %914 = vmatpush1.msra.mxu1 %v2269_v41 }
 0x243   : > { %844 = vmatprep.subr.mxu0 %v2274_v42  ;;  %915 = vmatprep.subr.mxu1 %v2276_v43 }
 0x244   : > { %845 = vmatpush1.msra.mxu0 %v3263_v3  ;;  %916 = vmatpush1.msra.mxu1 %v3264_v59 }
 0x245   : > { %846 = vmatprep.subr.mxu0 %v3265_v58  ;;  %917 = vmatprep.subr.mxu1 %v3266_v56 }
 0x246   : > { %847 = vmatpush1.msra.mxu0 %v3267_v60  ;;  %918 = vmatpush1.msra.mxu1 %v3268_v61 }
 0x247   : > { %848 = vmatprep.subr.mxu0 %v3269_v48  ;;  %919 = vmatprep.subr.mxu1 %v3270_v63  ;;  %v3291_v48 = vld [vmem:[#allocation32_spill] sm:$0xff] }
 0x248   : > { %849 = vmatpush1.msra.mxu0 %v3271_v52  ;;  %920 = vmatpush1.msra.mxu1 %v3272_v55  ;;  %v3282_v52 = vld [vmem:[#allocation26_spill] sm:$0xff]  ;;  %v3283_v55 = vld [vmem:[#allocation27_spill] sm:$0xff] }
 0x249   : > { %850 = vmatprep.subr.mxu0 %v3273_v50  ;;  %921 = vmatprep.subr.mxu1 %v3274_v62  ;;  %v3284_v50 = vmov 0.0   ;;  %v3285_v62 = vld [vmem:[#allocation28_spill] sm:$0xff] }
 0x24a   : > { %851 = vmatpush1.msra.mxu0 %v3275_v0  ;;  %922 = vmatpush1.msra.mxu1 %v3276_v46  ;;  %v3286_v46 = vld [vmem:[#allocation5_spill] sm:$0xff] }
 0x24b   : > { %852 = vmatprep.subr.mxu0 %v3277_v51  ;;  %923 = vmatprep.subr.mxu1 %v3278_v1  ;;  %v3287_v51 = vld [vmem:[#allocation6_spill] sm:$0xff]  ;;  %v2107_v1 = vmov 3  }
 0x24c   : > { %853 = vmatpush1.msra.mxu0 %v3279_v44  ;;  %924 = vmatpush1.msra.mxu1 %v3280_v57  ;;  %v3288_v44 = vld [vmem:[#allocation29_spill] sm:$0xff]  ;;  %v632_v57 = vpop.permute.xlu1 %631 }
 0x24d   : > { %854 = vmatprep.subr.mxu0 %v3281_v49  ;;  %925 = vmatprep.subr.mxu1 %v3282_v52  ;;  %v3289_v49 = vld [vmem:[#allocation30_spill] sm:$0xff]  ;;  %v3290_v52 = vld [vmem:[#allocation31_spill] sm:$0xff] }
 0x24e   : > { %855 = vmatpush1.msra.mxu0 %v3283_v55  ;;  %888 = vmatprep.mubr.f32.mxu0 %v3284_v50  ;;  %v634_v0 = vmul.f32 %v632_v57, %v3289_v49  ;;  %v635_v63 = vmul.f32 %v632_v57, %v3290_v52  ;;  %v636_v52 = vmul.f32 %v632_v57, %v2455_v45 }
 0x24f   : > { %926 = vmatpush1.msra.mxu1 %v3285_v62  ;;  %959 = vmatprep.mubr.f32.mxu1 %v3284_v50 }
 0x250   : > { %1006 = vmatprep.subr.mxu0 %v3286_v46  ;;  %1077 = vmatprep.subr.mxu1 %v3287_v51  ;;  %v638_v55 = vadd.f32 %v634_v0, %v2443_v2  ;;  %v639_v61 = vadd.f32 %v635_v63, %v3291_v48  ;;  %v637_v51 = vmul.f32 %v632_v57, %v2450_v53 }
 0x251   : > { %1863 = vset.pattern.permute.xlu1 %v2107_v1  ;;  %v640_v0 = vadd.f32 %v636_v52, %v2459_v54 }
 0x252   : > { %813 = vperm.xlu1 %1863, %v3288_v44   ;;  %v3292_v44 = vld [vmem:[#allocation33_spill] sm:$0xff] }
 0x253   : > { %v641_v59 = vadd.f32 %v637_v51, %v3292_v44 }
 0x2ef   : > { %v708_v62 = vpop.f32.mrf.mxu0  ;;  %v779_v1 = vpop.f32.mrf.mxu1 }
 0x2f0   : > { %v784_v60 = vadd.f32 %v708_v62, %v638_v55  ;;  %v786_v55 = vadd.f32 %v779_v1, %v640_v0  ;;  %v3322_v1 = vld [vmem:[#allocation33_spill] sm:$0xff] }
 0x2f1   : > { %v710_v50 = vpop.f32.mrf.mxu0  ;;  %v781_v49 = vpop.f32.mrf.mxu1 }
 0x2f2   : > { %v1810_v56 = vmul.f32 -1.442695, %v784_v60  ;;  %v785_v46 = vadd.f32 %v710_v50, %v639_v61  ;;  %v787_v3 = vadd.f32 %v781_v49, %v641_v59 }
 0x2f4   : > { %1901 = vpow2.f32 %v1810_v56  ;;  %v1811_v58 = vmul.f32 -1.442695, %v785_v46  ;;  %v1812_v63 = vmul.f32 -1.442695, %v787_v3 }
 0x2f6   : > { %1903 = vpow2.f32 %v1811_v58 }
 0x2f7   : > { %1905 = vpow2.f32 %v1812_v63 }
 0x301   : > { %v1902_v48 = vpop.eup %1901 }
 0x302   : > { %v791_v62 = vadd.f32 1.0, %v1902_v48 }
 0x303   : > { %v1904_v60 = vpop.eup %1903 }
 0x304   : > { %1907 = vrcp.f32 %v791_v62  ;;  %v797_v61 = vadd.f32 1.0, %v1904_v60  ;;  %v1906_v56 = vpop.eup %1905 }
 0x305   : > { %1909 = vtanh.f32 %v786_v55  ;;  %v804_v51 = vadd.f32 1.0, %v1906_v56 }
 0x306   : > { %1911 = vrcp.f32 %v797_v61 }
 0x307   : > { %1913 = vrcp.f32 %v804_v51 }
 0x311   : > { %v1908_v58 = vpop.eup %1907 }
 0x312   : > { %v1910_v50 = vpop.eup %1909 }
 0x313   : > { %v1912_v46 = vpop.eup %1911  ;;  %v808_v44 = vmul.f32 %v1910_v50, %v1908_v58 }
 0x314   : > { %v807_v59 = vmul.f32 %v1912_v46, %v2541_v47  ;;  %v1914_v3 = vpop.eup %1913 }
 0x316   : > { %v2620_v57 = vadd.f32 %v808_v44, %v807_v59 }
 0x318   : > { %1915 = vtanh.f32 %v2620_v57 }
 0x325   : > { %v1916_v48 = vpop.eup %1915 }
 0x326   : > { %v811_v52 = vmul.f32 %v1916_v48, %v1914_v3 }
 0x328   : > { %889 = vmatmul.mubr.f32.vlgmr.msra.gmra.mxu0 %v811_v52  ;;  %960 = vmatmul.mubr.f32.vlgmr.msra.gmra.mxu1 %v811_v52 }
 0x329   : > { %1007 = vmatpush1.msra.mxu0 %v2161_v4  ;;  %1078 = vmatpush1.msra.mxu1 %v2165_v5  ;;  %v3293_v4 = vld [vmem:[#allocation7_spill] sm:$0xff]  ;;  %v3294_v5 = vld [vmem:[#allocation8_spill] sm:$0xff] }
 0x32a   : > { %1008 = vmatprep.subr.mxu0 %v2167_v6  ;;  %1079 = vmatprep.subr.mxu1 %v2169_v7  ;;  %v3295_v6 = vld [vmem:[#allocation9_spill] sm:$0xff]  ;;  %v3296_v7 = vld [vmem:[#allocation10_spill] sm:$0xff] }
 0x32b   : > { %1009 = vmatpush1.msra.mxu0 %v2173_v8  ;;  %1080 = vmatpush1.msra.mxu1 %v2175_v9  ;;  %v3297_v8 = vld [vmem:[#allocation11_spill] sm:$0xff]  ;;  %v3298_v9 = vld [vmem:[#allocation12_spill] sm:$0xff] }
 0x32c   : > { %1010 = vmatprep.subr.mxu0 %v2177_v10  ;;  %1081 = vmatprep.subr.mxu1 %v2181_v11  ;;  %v3299_v10 = vld [vmem:[#allocation13_spill] sm:$0xff]  ;;  %v3300_v11 = vld [vmem:[#allocation14_spill] sm:$0xff] }
 0x32d   : > { %1011 = vmatpush1.msra.mxu0 %v2183_v12  ;;  %1082 = vmatpush1.msra.mxu1 %v2185_v13  ;;  %v3301_v12 = vld [vmem:[#allocation15_spill] sm:$0xff]  ;;  %v3302_v13 = vld [vmem:[#allocation16_spill] sm:$0xff] }
 0x32e   : > { %1012 = vmatprep.subr.mxu0 %v2189_v14  ;;  %1083 = vmatprep.subr.mxu1 %v2191_v15  ;;  %v3303_v14 = vld [vmem:[#allocation17_spill] sm:$0xff]  ;;  %v3304_v15 = vld [vmem:[#allocation18_spill] sm:$0xff] }
 0x32f   : > { %1013 = vmatpush1.msra.mxu0 %v2195_v16  ;;  %1084 = vmatpush1.msra.mxu1 %v2197_v17  ;;  %v3305_v16 = vld [vmem:[#allocation19_spill] sm:$0xff]  ;;  %v3306_v17 = vld [vmem:[#allocation20_spill] sm:$0xff] }
 0x330   : > { %1014 = vmatprep.subr.mxu0 %v2201_v18  ;;  %1085 = vmatprep.subr.mxu1 %v2203_v19  ;;  %v3307_v18 = vld [vmem:[#allocation21_spill] sm:$0xff]  ;;  %v3308_v19 = vld [vmem:[#allocation22_spill] sm:$0xff] }
 0x331   : > { %1015 = vmatpush1.msra.mxu0 %v2207_v20  ;;  %1086 = vmatpush1.msra.mxu1 %v2209_v21  ;;  %v3309_v20 = vld [vmem:[#allocation23_spill] sm:$0xff]  ;;  %v3310_v21 = vld [vmem:[#allocation24_spill] sm:$0xff] }
 0x332   : > { %1016 = vmatprep.subr.mxu0 %v2213_v22  ;;  %1087 = vmatprep.subr.mxu1 %v2215_v23  ;;  %v3311_v22 = vld [vmem:[#allocation25_spill] sm:$0xff]  ;;  %v3312_v23 = vld [vmem:[#allocation26_spill] sm:$0xff] }
 0x333   : > { %1017 = vmatpush1.msra.mxu0 %v2219_v24  ;;  %1088 = vmatpush1.msra.mxu1 %v2221_v25  ;;  %v3313_v24 = vld [vmem:[#allocation27_spill] sm:$0xff]  ;;  %v3314_v25 = vmov 0.0  }
 0x334   : > { %1018 = vmatprep.subr.mxu0 %v2225_v26  ;;  %1089 = vmatprep.subr.mxu1 %v2227_v27  ;;  %v3315_v26 = vld [vmem:[#allocation28_spill] sm:$0xff]  ;;  %v2687_v27 = vld [vmem:[#allocation2 + $0x1e8] sm:$0xff] }
 0x335   : > { %1019 = vmatpush1.msra.mxu0 %v2231_v28  ;;  %1090 = vmatpush1.msra.mxu1 %v2233_v29  ;;  %3316 = vst [vmem:[#allocation5_spill] sm:$0xff] %v2687_v27  ;;  %v2690_v28 = vld [vmem:[#allocation2 + $0x1f8] sm:$0xff]  ;;  %v2108_v29 = vmov 4  }
 0x336   : > { %1020 = vmatprep.subr.mxu0 %v2237_v30  ;;  %1091 = vmatprep.subr.mxu1 %v2239_v31  ;;  %3317 = vst [vmem:[#allocation6_spill] sm:$0xff] %v2690_v28  ;;  %v3318_v30 = vld [vmem:[#allocation29_spill] sm:$0xff]  ;;  %v814_v31 = vpop.permute.xlu1 %813 }
 0x337   : > { %1021 = vmatpush1.msra.mxu0 %v2243_v32  ;;  %1092 = vmatpush1.msra.mxu1 %v2245_v33  ;;  %v3319_v32 = vld [vmem:[#allocation30_spill] sm:$0xff]  ;;  %v819_v47 = vmul.f32 %v814_v31, %v2450_v53  ;;  %v818_v55 = vmul.f32 %v814_v31, %v2455_v45 }
 0x338   : > { %1022 = vmatprep.subr.mxu0 %v2249_v34  ;;  %1093 = vmatprep.subr.mxu1 %v2251_v35  ;;  %v816_v33 = vmul.f32 %v814_v31, %v3319_v32  ;;  %v3320_v34 = vld [vmem:[#allocation31_spill] sm:$0xff] }
 0x339   : > { %1023 = vmatpush1.msra.mxu0 %v2255_v36  ;;  %1094 = vmatpush1.msra.mxu1 %v2257_v37  ;;  %v817_v35 = vmul.f32 %v814_v31, %v3320_v34  ;;  %v3321_v37 = vld [vmem:[#allocation32_spill] sm:$0xff]  ;;  %v823_v0 = vadd.f32 %v819_v47, %v3322_v1  ;;  %v822_v60 = vadd.f32 %v818_v55, %v2459_v54  ;;  %v2760_v31 = vld [vmem:[#allocation2 + $0x148] sm:$0xff]  ;;  %v2790_v47 = vld [vmem:[#allocation2 + $0x100] sm:$0xff] }
 0x33a   : > { %1024 = vmatprep.subr.mxu0 %v2261_v38  ;;  %1095 = vmatprep.subr.mxu1 %v2263_v39  ;;  %v820_v36 = vadd.f32 %v816_v33, %v2443_v2  ;;  %v2763_v33 = vld [vmem:[#allocation2 + $0x158] sm:$0xff]  ;;  %v2805_v55 = vld [vmem:[#allocation2 + $0xf0] sm:$0xff] }
 0x33b   : > { %1025 = vmatpush1.msra.mxu0 %v2267_v40  ;;  %1096 = vmatpush1.msra.mxu1 %v2269_v41  ;;  %v821_v38 = vadd.f32 %v817_v35, %v3321_v37  ;;  %v2766_v35 = vld [vmem:[#allocation2 + $0x140] sm:$0xff] }
 0x33c   : > { %1026 = vmatprep.subr.mxu0 %v2274_v42  ;;  %1097 = vmatprep.subr.mxu1 %v2276_v43 }
 0x33d   : > { %1027 = vmatpush1.msra.mxu0 %v3293_v4  ;;  %1098 = vmatpush1.msra.mxu1 %v3294_v5 }
 0x33e   : > { %1028 = vmatprep.subr.mxu0 %v3295_v6  ;;  %1099 = vmatprep.subr.mxu1 %v3296_v7 }
 0x33f   : > { %1029 = vmatpush1.msra.mxu0 %v3297_v8  ;;  %1100 = vmatpush1.msra.mxu1 %v3298_v9 }
 0x340   : > { %1030 = vmatprep.subr.mxu0 %v3299_v10  ;;  %1101 = vmatprep.subr.mxu1 %v3300_v11  ;;  %v2706_v11 = vld [vmem:[#allocation2 + $0x1e0] sm:$0xff] }
 0x341   : > { %1031 = vmatpush1.msra.mxu0 %v3301_v12  ;;  %1102 = vmatpush1.msra.mxu1 %v3302_v13  ;;  %v2709_v12 = vld [vmem:[#allocation2 + $0x1f0] sm:$0xff]  ;;  %v2712_v13 = vld [vmem:[#allocation2 + $0x1c8] sm:$0xff] }
 0x342   : > { %1032 = vmatprep.subr.mxu0 %v3303_v14  ;;  %1103 = vmatprep.subr.mxu1 %v3304_v15  ;;  %v2718_v14 = vld [vmem:[#allocation2 + $0x1c0] sm:$0xff]  ;;  %v2721_v15 = vld [vmem:[#allocation2 + $0x1d0] sm:$0xff] }
 0x343   : > { %1033 = vmatpush1.msra.mxu0 %v3305_v16  ;;  %1104 = vmatpush1.msra.mxu1 %v3306_v17  ;;  %v2724_v16 = vld [vmem:[#allocation2 + $0x1a8] sm:$0xff]  ;;  %v2727_v17 = vld [vmem:[#allocation2 + $0x1b8] sm:$0xff] }
 0x344   : > { %1034 = vmatprep.subr.mxu0 %v3307_v18  ;;  %1105 = vmatprep.subr.mxu1 %v3308_v19  ;;  %v2730_v18 = vld [vmem:[#allocation2 + $0x1a0] sm:$0xff]  ;;  %v2733_v19 = vld [vmem:[#allocation2 + $0x1b0] sm:$0xff] }
 0x345   : > { %1035 = vmatpush1.msra.mxu0 %v3309_v20  ;;  %1106 = vmatpush1.msra.mxu1 %v3310_v21  ;;  %v2736_v20 = vld [vmem:[#allocation2 + $0x188] sm:$0xff]  ;;  %v2739_v21 = vld [vmem:[#allocation2 + $0x198] sm:$0xff] }
 0x346   : > { %1036 = vmatprep.subr.mxu0 %v3311_v22  ;;  %1107 = vmatprep.subr.mxu1 %v3312_v23  ;;  %v2742_v22 = vld [vmem:[#allocation2 + $0x180] sm:$0xff]  ;;  %v2745_v23 = vld [vmem:[#allocation2 + $0x190] sm:$0xff] }
 0x347   : > { %1037 = vmatpush1.msra.mxu0 %v3313_v24  ;;  %1070 = vmatprep.mubr.f32.mxu0 %v3314_v25  ;;  %v2748_v24 = vld [vmem:[#allocation2 + $0x168] sm:$0xff] }
 0x348   : > { %1108 = vmatpush1.msra.mxu1 %v3315_v26  ;;  %1141 = vmatprep.mubr.f32.mxu1 %v3314_v25  ;;  %v2751_v26 = vld [vmem:[#allocation2 + $0x178] sm:$0xff] }
 0x349   : > { %1188 = vmatprep.subr.mxu0 %v2687_v27  ;;  %1259 = vmatprep.subr.mxu1 %v2690_v28 }
 0x34a   : > { %1864 = vset.pattern.permute.xlu1 %v2108_v29  ;;  %v2754_v29 = vld [vmem:[#allocation2 + $0x160] sm:$0xff] }
 0x34b   : > { %995 = vperm.xlu1 %1864, %v3318_v30   ;;  %v2757_v30 = vld [vmem:[#allocation2 + $0x170] sm:$0xff] }
 0x3e8   : > { %v890_v39 = vpop.f32.mrf.mxu0  ;;  %v961_v44 = vpop.f32.mrf.mxu1 }
 0x3e9   : > { %v966_v40 = vadd.f32 %v890_v39, %v820_v36  ;;  %v968_v58 = vadd.f32 %v961_v44, %v822_v60  ;;  %v2769_v36 = vld [vmem:[#allocation2 + $0x150] sm:$0xff]  ;;  %v2775_v39 = vld [vmem:[#allocation2 + $0x138] sm:$0xff] }
 0x3ea   : > { %v892_v41 = vpop.f32.mrf.mxu0  ;;  %v963_v63 = vpop.f32.mrf.mxu1  ;;  %v2793_v44 = vld [vmem:[#allocation2 + $0x110] sm:$0xff]  ;;  %v2811_v60 = vld [vmem:[#allocation2 + $0xd8] sm:$0xff] }
 0x3eb   : > { %v1813_v42 = vmul.f32 -1.442695, %v966_v40  ;;  %v967_v43 = vadd.f32 %v892_v41, %v821_v38  ;;  %v969_v62 = vadd.f32 %v963_v63, %v823_v0  ;;  %v2772_v38 = vld [vmem:[#allocation2 + $0x128] sm:$0xff]  ;;  %v2778_v40 = vld [vmem:[#allocation2 + $0x120] sm:$0xff]  ;;  %v2781_v41 = vld [vmem:[#allocation2 + $0x130] sm:$0xff] }
 0x3ec   : > { %v2799_v0 = vld [vmem:[#allocation2 + $0xf8] sm:$0xff]  ;;  %v2802_v63 = vld [vmem:[#allocation2 + $0xe0] sm:$0xff] }
 0x3ed   : > { %1917 = vpow2.f32 %v1813_v42  ;;  %v1814_v49 = vmul.f32 -1.442695, %v967_v43  ;;  %v1815_v61 = vmul.f32 -1.442695, %v969_v62  ;;  %v2784_v42 = vld [vmem:[#allocation2 + $0x108] sm:$0xff]  ;;  %v2787_v43 = vld [vmem:[#allocation2 + $0x118] sm:$0xff] }
 0x3ee   : > { %v2808_v62 = vld [vmem:[#allocation2 + $0xc8] sm:$0xff] }
 0x3ef   : > { %1919 = vpow2.f32 %v1814_v49  ;;  %v2796_v49 = vld [vmem:[#allocation2 + $0xe8] sm:$0xff] }
 0x3f0   : > { %1921 = vpow2.f32 %v1815_v61  ;;  %v2814_v61 = vld [vmem:[#allocation2 + $0xc0] sm:$0xff] }
 0x3fa   : > { %v1918_v56 = vpop.eup %1917 }
 0x3fb   : > { %v973_v50 = vadd.f32 1.0, %v1918_v56  ;;  %v2817_v56 = vld [vmem:[#allocation2 + $0xd0] sm:$0xff] }
 0x3fc   : > { %v1920_v46 = vpop.eup %1919 }
 0x3fd   : > { %1923 = vrcp.f32 %v973_v50  ;;  %v979_v51 = vadd.f32 1.0, %v1920_v46  ;;  %v1922_v59 = vpop.eup %1921  ;;  %v2823_v50 = vld [vmem:[#allocation2 + $0xb8] sm:$0xff]  ;;  %v2826_v46 = vld [vmem:[#allocation2 + $0xa0] sm:$0xff] }
 0x3fe   : > { %1925 = vtanh.f32 %v968_v58  ;;  %v986_v4 = vadd.f32 1.0, %v1922_v59  ;;  %v2820_v58 = vld [vmem:[#allocation2 + $0xa8] sm:$0xff]  ;;  %3323 = vst [vmem:[#allocation7_spill] sm:$0xff] %v2826_v46 }
 0x3ff   : > { %1927 = vrcp.f32 %v979_v51  ;;  %v2829_v51 = vld [vmem:[#allocation2 + $0xb0] sm:$0xff]  ;;  %v2832_v59 = vld [vmem:[#allocation2 + $0x88] sm:$0xff] }
 0x400   : > { %1929 = vrcp.f32 %v986_v4  ;;  %3324 = vst [vmem:[#allocation8_spill] sm:$0xff] %v2829_v51  ;;  %3325 = vst [vmem:[#allocation9_spill] sm:$0xff] %v2832_v59  ;;  %v2844_v4 = vld [vmem:[#allocation2 + $0x68] sm:$0xff] }
 0x401   : > { %3329 = vst [vmem:[#allocation13_spill] sm:$0xff] %v2844_v4 }
 0x40a   : > { %v1924_v3 = vpop.eup %1923 }
 0x40b   : > { %v1926_v48 = vpop.eup %1925 }
 0x40c   : > { %v1928_v52 = vpop.eup %1927  ;;  %v990_v5 = vmul.f32 %v1926_v48, %v1924_v3  ;;  %v2835_v3 = vld [vmem:[#allocation2 + $0x98] sm:$0xff]  ;;  %v2838_v48 = vld [vmem:[#allocation2 + $0x80] sm:$0xff] }
 0x40d   : > { %v989_v6 = vmul.f32 %v1928_v52, %v2620_v57  ;;  %v1930_v8 = vpop.eup %1929  ;;  %v2715_v57 = vld [vmem:[#allocation2 + $0x1d8] sm:$0xff]  ;;  %3326 = vst [vmem:[#allocation10_spill] sm:$0xff] %v2835_v3  ;;  %3327 = vst [vmem:[#allocation11_spill] sm:$0xff] %v2838_v48  ;;  %v2841_v52 = vld [vmem:[#allocation2 + $0x90] sm:$0xff] }
 0x40e   : > { %3328 = vst [vmem:[#allocation12_spill] sm:$0xff] %v2841_v52 }
 0x40f   : > { %v2703_v7 = vadd.f32 %v990_v5, %v989_v6  ;;  %v2847_v5 = vld [vmem:[#allocation2 + $0x78] sm:$0xff]  ;;  %v2850_v6 = vld [vmem:[#allocation2 + $0x60] sm:$0xff] }
 0x410   : > { %3330 = vst [vmem:[#allocation14_spill] sm:$0xff] %v2847_v5  ;;  %3331 = vst [vmem:[#allocation15_spill] sm:$0xff] %v2850_v6 }
 0x411   : > { %1931 = vtanh.f32 %v2703_v7 }
 0x41e   : > { %v1932_v9 = vpop.eup %1931 }
 0x41f   : > { %v993_v10 = vmul.f32 %v1932_v9, %v1930_v8  ;;  %v2853_v8 = vld [vmem:[#allocation2 + $0x70] sm:$0xff]  ;;  %v2856_v9 = vld [vmem:[#allocation2 + $0x48] sm:$0xff] }
 0x420   : > { %3332 = vst [vmem:[#allocation16_spill] sm:$0xff] %v2853_v8  ;;  %3333 = vst [vmem:[#allocation17_spill] sm:$0xff] %v2856_v9 }
 0x421   : > { %1071 = vmatmul.mubr.f32.vlgmr.msra.gmra.mxu0 %v993_v10  ;;  %1142 = vmatmul.mubr.f32.vlgmr.msra.gmra.mxu1 %v993_v10  ;;  %v2859_v10 = vld [vmem:[#allocation2 + $0x58] sm:$0xff] }
 0x422   : > { %1189 = vmatpush1.msra.mxu0 %v2706_v11  ;;  %1260 = vmatpush1.msra.mxu1 %v2709_v12  ;;  %3334 = vst [vmem:[#allocation18_spill] sm:$0xff] %v2859_v10 }
 0x423   : > { %1190 = vmatprep.subr.mxu0 %v2712_v13  ;;  %1261 = vmatprep.subr.mxu1 %v2715_v57 }
 0x424   : > { %1191 = vmatpush1.msra.mxu0 %v2718_v14  ;;  %1262 = vmatpush1.msra.mxu1 %v2721_v15 }
 0x425   : > { %1192 = vmatprep.subr.mxu0 %v2724_v16  ;;  %1263 = vmatprep.subr.mxu1 %v2727_v17 }
 0x426   : > { %1193 = vmatpush1.msra.mxu0 %v2730_v18  ;;  %1264 = vmatpush1.msra.mxu1 %v2733_v19 }
 0x427   : > { %1194 = vmatprep.subr.mxu0 %v2736_v20  ;;  %1265 = vmatprep.subr.mxu1 %v2739_v21 }
 0x428   : > { %1195 = vmatpush1.msra.mxu0 %v2742_v22  ;;  %1266 = vmatpush1.msra.mxu1 %v2745_v23 }
 0x429   : > { %1196 = vmatprep.subr.mxu0 %v2748_v24  ;;  %1267 = vmatprep.subr.mxu1 %v2751_v26 }
 0x42a   : > { %1197 = vmatpush1.msra.mxu0 %v2754_v29  ;;  %1268 = vmatpush1.msra.mxu1 %v2757_v30 }
 0x42b   : > { %1198 = vmatprep.subr.mxu0 %v2760_v31  ;;  %1269 = vmatprep.subr.mxu1 %v2763_v33 }
 0x42c   : > { %1199 = vmatpush1.msra.mxu0 %v2766_v35  ;;  %1270 = vmatpush1.msra.mxu1 %v2769_v36 }
 0x42d   : > { %1200 = vmatprep.subr.mxu0 %v2772_v38  ;;  %1271 = vmatprep.subr.mxu1 %v2775_v39 }
 0x42e   : > { %1201 = vmatpush1.msra.mxu0 %v2778_v40  ;;  %1272 = vmatpush1.msra.mxu1 %v2781_v41 }
 0x42f   : > { %1202 = vmatprep.subr.mxu0 %v2784_v42  ;;  %1273 = vmatprep.subr.mxu1 %v2787_v43 }
 0x430   : > { %1203 = vmatpush1.msra.mxu0 %v2790_v47  ;;  %1274 = vmatpush1.msra.mxu1 %v2793_v44 }
 0x431   : > { %1204 = vmatprep.subr.mxu0 %v2796_v49  ;;  %1275 = vmatprep.subr.mxu1 %v2799_v0 }
 0x432   : > { %1205 = vmatpush1.msra.mxu0 %v2802_v63  ;;  %1276 = vmatpush1.msra.mxu1 %v2805_v55 }
 0x433   : > { %1206 = vmatprep.subr.mxu0 %v2808_v62  ;;  %1277 = vmatprep.subr.mxu1 %v2811_v60 }
 0x434   : > { %1207 = vmatpush1.msra.mxu0 %v2814_v61  ;;  %1278 = vmatpush1.msra.mxu1 %v2817_v56 }
 0x435   : > { %1208 = vmatprep.subr.mxu0 %v2820_v58  ;;  %1279 = vmatprep.subr.mxu1 %v2823_v50 }
 0x436   : > { %1209 = vmatpush1.msra.mxu0 %v2826_v46  ;;  %1280 = vmatpush1.msra.mxu1 %v2829_v51 }
 0x437   : > { %1210 = vmatprep.subr.mxu0 %v2832_v59  ;;  %1281 = vmatprep.subr.mxu1 %v2835_v3 }
 0x438   : > { %1211 = vmatpush1.msra.mxu0 %v2838_v48  ;;  %1282 = vmatpush1.msra.mxu1 %v2841_v52 }
 0x439   : > { %1212 = vmatprep.subr.mxu0 %v2844_v4  ;;  %1283 = vmatprep.subr.mxu1 %v2847_v5  ;;  %v2862_v4 = vld [vmem:[#allocation2 + $0x40] sm:$0xff]  ;;  %v2865_v5 = vld [vmem:[#allocation2 + $0x50] sm:$0xff] }
 0x43a   : > { %1213 = vmatpush1.msra.mxu0 %v2850_v6  ;;  %1284 = vmatpush1.msra.mxu1 %v2853_v8  ;;  %3335 = vst [vmem:[#allocation19_spill] sm:$0xff] %v2862_v4  ;;  %3336 = vst [vmem:[#allocation20_spill] sm:$0xff] %v2865_v5  ;;  %v2868_v6 = vld [vmem:[#allocation2 + $0x28] sm:$0xff]  ;;  %v2871_v8 = vld [vmem:[#allocation2 + $0x38] sm:$0xff] }
 0x43b   : > { %1214 = vmatprep.subr.mxu0 %v2856_v9  ;;  %1285 = vmatprep.subr.mxu1 %v2859_v10  ;;  %3337 = vst [vmem:[#allocation21_spill] sm:$0xff] %v2868_v6  ;;  %3338 = vst [vmem:[#allocation22_spill] sm:$0xff] %v2871_v8  ;;  %v2874_v9 = vld [vmem:[#allocation2 + $0x20] sm:$0xff]  ;;  %v2877_v10 = vld [vmem:[#allocation2 + $0x30] sm:$0xff] }
 0x43c   : > { %1215 = vmatpush1.msra.mxu0 %v2862_v4  ;;  %1286 = vmatpush1.msra.mxu1 %v2865_v5  ;;  %3339 = vst [vmem:[#allocation23_spill] sm:$0xff] %v2874_v9  ;;  %3340 = vst [vmem:[#allocation24_spill] sm:$0xff] %v2877_v10  ;;  %v2880_v4 = vld [vmem:[#allocation2 + $0x8] sm:$0xff]  ;;  %v2883_v5 = vld [vmem:[#allocation2 + $0x18] sm:$0xff] }
 0x43d   : > { %1216 = vmatprep.subr.mxu0 %v2868_v6  ;;  %1287 = vmatprep.subr.mxu1 %v2871_v8  ;;  %3341 = vst [vmem:[#allocation25_spill] sm:$0xff] %v2880_v4  ;;  %3342 = vst [vmem:[#allocation26_spill] sm:$0xff] %v2883_v5  ;;  %v2886_v6 = vld [vmem:[#allocation2] sm:$0xff] }
 0x43e   : > { %1217 = vmatpush1.msra.mxu0 %v2874_v9  ;;  %1288 = vmatpush1.msra.mxu1 %v2877_v10  ;;  %3343 = vst [vmem:[#allocation27_spill] sm:$0xff] %v2886_v6  ;;  %v2890_v9 = vld [vmem:[#allocation2 + $0x10] sm:$0xff]  ;;  %v2897_v10 = vld [vmem:[%s2349_s22] sm:$0xff] }
 0x43f   : > { %1218 = vmatprep.subr.mxu0 %v2880_v4  ;;  %1289 = vmatprep.subr.mxu1 %v2883_v5  ;;  %3344 = vst [vmem:[#allocation28_spill] sm:$0xff] %v2890_v9  ;;  %v2109_v4 = vmov 5   ;;  %3345 = vst [vmem:[#allocation29_spill] sm:$0xff] %v2897_v10  ;;  %v996_v5 = vpop.permute.xlu1 %995 }
 0x440   : > { %1219 = vmatpush1.msra.mxu0 %v2886_v6  ;;  %1252 = vmatprep.mubr.f32.mxu0 %v3314_v25  ;;  %v998_v6 = vmul.f32 %v996_v5, %v3319_v32  ;;  %v999_v8 = vmul.f32 %v996_v5, %v3320_v34  ;;  %v1000_v34 = vmul.f32 %v996_v5, %v2455_v45 }
 0x441   : > { %1290 = vmatpush1.msra.mxu1 %v2890_v9  ;;  %1323 = vmatprep.mubr.f32.mxu1 %v3314_v25 }
 0x442   : > { %1370 = vmatprep.subr.mxu0 %v2687_v27  ;;  %1441 = vmatprep.subr.mxu1 %v2690_v28  ;;  %v1002_v52 = vadd.f32 %v998_v6, %v2443_v2  ;;  %v1003_v9 = vadd.f32 %v999_v8, %v3321_v37  ;;  %v1004_v6 = vadd.f32 %v1000_v34, %v2459_v54 }
 0x443   : > { %1865 = vset.pattern.permute.xlu0 %v2109_v4  ;;  %v1001_v4 = vmul.f32 %v996_v5, %v2450_v53 }
 0x444   : > { %1177 = vperm.xlu0 %1865, %v2897_v10  }
 0x445   : > { %v1005_v10 = vadd.f32 %v1001_v4, %v3322_v1 }
 0x4e1   : > { %v1072_v25 = vpop.f32.mrf.mxu0  ;;  %v1143_v59 = vpop.f32.mrf.mxu1 }
 0x4e2   : > { %v1148_v48 = vadd.f32 %v1072_v25, %v1002_v52  ;;  %v1150_v25 = vadd.f32 %v1143_v59, %v1004_v6  ;;  %v3348_v59 = vld [vmem:[#allocation9_spill] sm:$0xff]  ;;  %v3350_v6 = vld [vmem:[#allocation11_spill] sm:$0xff] }
 0x4e3   : > { %v1074_v27 = vpop.f32.mrf.mxu0  ;;  %v1145_v32 = vpop.f32.mrf.mxu1 }
 0x4e4   : > { %v1816_v3 = vmul.f32 -1.442695, %v1148_v48  ;;  %v1149_v28 = vadd.f32 %v1074_v27, %v1003_v9  ;;  %v1151_v46 = vadd.f32 %v1145_v32, %v1005_v10  ;;  %v3349_v10 = vld [vmem:[#allocation10_spill] sm:$0xff] }
 0x4e6   : > { %1933 = vpow2.f32 %v1816_v3  ;;  %v1817_v51 = vmul.f32 -1.442695, %v1149_v28  ;;  %v1818_v8 = vmul.f32 -1.442695, %v1151_v46 }
 0x4e8   : > { %1935 = vpow2.f32 %v1817_v51 }
 0x4e9   : > { %1937 = vpow2.f32 %v1818_v8  ;;  %v3351_v8 = vld [vmem:[#allocation12_spill] sm:$0xff] }
 0x4f3   : > { %v1934_v37 = vpop.eup %1933 }
 0x4f4   : > { %v1155_v52 = vadd.f32 1.0, %v1934_v37 }
 0x4f5   : > { %v1936_v48 = vpop.eup %1935 }
 0x4f6   : > { %1939 = vrcp.f32 %v1155_v52  ;;  %v1161_v27 = vadd.f32 1.0, %v1936_v48  ;;  %v1938_v28 = vpop.eup %1937  ;;  %v3353_v52 = vld [vmem:[#allocation14_spill] sm:$0xff]  ;;  %v3354_v48 = vld [vmem:[#allocation15_spill] sm:$0xff] }
 0x4f7   : > { %1941 = vtanh.f32 %v1150_v25  ;;  %v1168_v4 = vadd.f32 1.0, %v1938_v28  ;;  %v3352_v25 = vld [vmem:[#allocation13_spill] sm:$0xff] }
 0x4f8   : > { %1943 = vrcp.f32 %v1161_v27  ;;  %v3355_v27 = vld [vmem:[#allocation16_spill] sm:$0xff]  ;;  %v3356_v28 = vld [vmem:[#allocation17_spill] sm:$0xff] }
 0x4f9   : > { %1945 = vrcp.f32 %v1168_v4  ;;  %v3360_v4 = vld [vmem:[#allocation21_spill] sm:$0xff] }
 0x503   : > { %v1940_v51 = vpop.eup %1939 }
 0x504   : > { %v1942_v3 = vpop.eup %1941 }
 0x505   : > { %v1944_v9 = vpop.eup %1943  ;;  %v1172_v1 = vmul.f32 %v1942_v3, %v1940_v51  ;;  %v3357_v51 = vld [vmem:[#allocation18_spill] sm:$0xff]  ;;  %v3358_v3 = vld [vmem:[#allocation19_spill] sm:$0xff] }
 0x506   : > { %v1171_v32 = vmul.f32 %v1944_v9, %v2703_v7  ;;  %v1946_v34 = vpop.eup %1945  ;;  %v3347_v7 = vld [vmem:[#allocation8_spill] sm:$0xff] }
 0x507   : > { %v3359_v9 = vld [vmem:[#allocation20_spill] sm:$0xff] }
 0x508   : > { %v2909_v5 = vadd.f32 %v1172_v1, %v1171_v32  ;;  %v3346_v1 = vld [vmem:[#allocation7_spill] sm:$0xff]  ;;  %v3361_v32 = vld [vmem:[#allocation22_spill] sm:$0xff] }
 0x50a   : > { %1947 = vtanh.f32 %v2909_v5 }
 0x517   : > { %v1948_v37 = vpop.eup %1947 }
 0x518   : > { %v1175_v46 = vmul.f32 %v1948_v37, %v1946_v34  ;;  %v3362_v34 = vld [vmem:[#allocation23_spill] sm:$0xff]  ;;  %v3363_v37 = vld [vmem:[#allocation24_spill] sm:$0xff] }
 0x51a   : > { %1253 = vmatmul.mubr.f32.vlgmr.msra.gmra.mxu0 %v1175_v46  ;;  %1324 = vmatmul.mubr.f32.vlgmr.msra.gmra.mxu1 %v1175_v46  ;;  %v3364_v46 = vld [vmem:[#allocation25_spill] sm:$0xff] }
 0x51b   : > { %1371 = vmatpush1.msra.mxu0 %v2706_v11  ;;  %1442 = vmatpush1.msra.mxu1 %v2709_v12 }
 0x51c   : > { %1372 = vmatprep.subr.mxu0 %v2712_v13  ;;  %1443 = vmatprep.subr.mxu1 %v2715_v57 }
 0x51d   : > { %1373 = vmatpush1.msra.mxu0 %v2718_v14  ;;  %1444 = vmatpush1.msra.mxu1 %v2721_v15 }
 0x51e   : > { %1374 = vmatprep.subr.mxu0 %v2724_v16  ;;  %1445 = vmatprep.subr.mxu1 %v2727_v17 }
 0x51f   : > { %1375 = vmatpush1.msra.mxu0 %v2730_v18  ;;  %1446 = vmatpush1.msra.mxu1 %v2733_v19 }
 0x520   : > { %1376 = vmatprep.subr.mxu0 %v2736_v20  ;;  %1447 = vmatprep.subr.mxu1 %v2739_v21 }
 0x521   : > { %1377 = vmatpush1.msra.mxu0 %v2742_v22  ;;  %1448 = vmatpush1.msra.mxu1 %v2745_v23 }
 0x522   : > { %1378 = vmatprep.subr.mxu0 %v2748_v24  ;;  %1449 = vmatprep.subr.mxu1 %v2751_v26 }
 0x523   : > { %1379 = vmatpush1.msra.mxu0 %v2754_v29  ;;  %1450 = vmatpush1.msra.mxu1 %v2757_v30 }
 0x524   : > { %1380 = vmatprep.subr.mxu0 %v2760_v31  ;;  %1451 = vmatprep.subr.mxu1 %v2763_v33 }
 0x525   : > { %1381 = vmatpush1.msra.mxu0 %v2766_v35  ;;  %1452 = vmatpush1.msra.mxu1 %v2769_v36 }
 0x526   : > { %1382 = vmatprep.subr.mxu0 %v2772_v38  ;;  %1453 = vmatprep.subr.mxu1 %v2775_v39 }
 0x527   : > { %1383 = vmatpush1.msra.mxu0 %v2778_v40  ;;  %1454 = vmatpush1.msra.mxu1 %v2781_v41 }
 0x528   : > { %1384 = vmatprep.subr.mxu0 %v2784_v42  ;;  %1455 = vmatprep.subr.mxu1 %v2787_v43 }
 0x529   : > { %1385 = vmatpush1.msra.mxu0 %v2790_v47  ;;  %1456 = vmatpush1.msra.mxu1 %v2793_v44 }
 0x52a   : > { %1386 = vmatprep.subr.mxu0 %v2796_v49  ;;  %1457 = vmatprep.subr.mxu1 %v2799_v0 }
 0x52b   : > { %1387 = vmatpush1.msra.mxu0 %v2802_v63  ;;  %1458 = vmatpush1.msra.mxu1 %v2805_v55 }
 0x52c   : > { %1388 = vmatprep.subr.mxu0 %v2808_v62  ;;  %1459 = vmatprep.subr.mxu1 %v2811_v60 }
 0x52d   : > { %1389 = vmatpush1.msra.mxu0 %v2814_v61  ;;  %1460 = vmatpush1.msra.mxu1 %v2817_v56 }
 0x52e   : > { %1390 = vmatprep.subr.mxu0 %v2820_v58  ;;  %1461 = vmatprep.subr.mxu1 %v2823_v50 }
 0x52f   : > { %1391 = vmatpush1.msra.mxu0 %v3346_v1  ;;  %1462 = vmatpush1.msra.mxu1 %v3347_v7 }
 0x530   : > { %1392 = vmatprep.subr.mxu0 %v3348_v59  ;;  %1463 = vmatprep.subr.mxu1 %v3349_v10 }
 0x531   : > { %1393 = vmatpush1.msra.mxu0 %v3350_v6  ;;  %1464 = vmatpush1.msra.mxu1 %v3351_v8 }
 0x532   : > { %1394 = vmatprep.subr.mxu0 %v3352_v25  ;;  %1465 = vmatprep.subr.mxu1 %v3353_v52  ;;  %v3374_v25 = vld [vmem:[#allocation32_spill] sm:$0xff] }
 0x533   : > { %1395 = vmatpush1.msra.mxu0 %v3354_v48  ;;  %1466 = vmatpush1.msra.mxu1 %v3355_v27  ;;  %v3365_v48 = vld [vmem:[#allocation26_spill] sm:$0xff]  ;;  %v3366_v27 = vld [vmem:[#allocation27_spill] sm:$0xff] }
 0x534   : > { %1396 = vmatprep.subr.mxu0 %v3356_v28  ;;  %1467 = vmatprep.subr.mxu1 %v3357_v51  ;;  %v3367_v28 = vmov 0.0   ;;  %v3368_v51 = vld [vmem:[#allocation28_spill] sm:$0xff] }
 0x535   : > { %1397 = vmatpush1.msra.mxu0 %v3358_v3  ;;  %1468 = vmatpush1.msra.mxu1 %v3359_v9  ;;  %v3369_v9 = vld [vmem:[#allocation5_spill] sm:$0xff] }
 0x536   : > { %1398 = vmatprep.subr.mxu0 %v3360_v4  ;;  %1469 = vmatprep.subr.mxu1 %v3361_v32  ;;  %v3370_v4 = vld [vmem:[#allocation6_spill] sm:$0xff]  ;;  %v2110_v32 = vmov 6  }
 0x537   : > { %1399 = vmatpush1.msra.mxu0 %v3362_v34  ;;  %1470 = vmatpush1.msra.mxu1 %v3363_v37  ;;  %v3371_v34 = vld [vmem:[#allocation29_spill] sm:$0xff]  ;;  %v1178_v37 = vpop.permute.xlu0 %1177 }
 0x538   : > { %1400 = vmatprep.subr.mxu0 %v3364_v46  ;;  %1471 = vmatprep.subr.mxu1 %v3365_v48  ;;  %v3372_v46 = vld [vmem:[#allocation30_spill] sm:$0xff]  ;;  %v3373_v48 = vld [vmem:[#allocation31_spill] sm:$0xff] }
 0x539   : > { %1401 = vmatpush1.msra.mxu0 %v3366_v27  ;;  %1434 = vmatprep.mubr.f32.mxu0 %v3367_v28  ;;  %v1180_v3 = vmul.f32 %v1178_v37, %v3372_v46  ;;  %v1181_v52 = vmul.f32 %v1178_v37, %v3373_v48  ;;  %v1182_v48 = vmul.f32 %v1178_v37, %v2455_v45 }
 0x53a   : > { %1472 = vmatpush1.msra.mxu1 %v3368_v51  ;;  %1505 = vmatprep.mubr.f32.mxu1 %v3367_v28 }
 0x53b   : > { %1552 = vmatprep.subr.mxu0 %v3369_v9  ;;  %1623 = vmatprep.subr.mxu1 %v3370_v4  ;;  %v1184_v27 = vadd.f32 %v1180_v3, %v2443_v2  ;;  %v1185_v8 = vadd.f32 %v1181_v52, %v3374_v25  ;;  %v1183_v4 = vmul.f32 %v1178_v37, %v2450_v53 }
 0x53c   : > { %1866 = vset.pattern.permute.xlu1 %v2110_v32  ;;  %v1186_v3 = vadd.f32 %v1182_v48, %v2459_v54 }
 0x53d   : > { %1359 = vperm.xlu1 %1866, %v3371_v34   ;;  %v3375_v34 = vld [vmem:[#allocation33_spill] sm:$0xff] }
 0x53e   : > { %v1187_v7 = vadd.f32 %v1183_v4, %v3375_v34 }
 0x5da   : > { %v1254_v51 = vpop.f32.mrf.mxu0  ;;  %v1325_v32 = vpop.f32.mrf.mxu1 }
 0x5db   : > { %v1330_v6 = vadd.f32 %v1254_v51, %v1184_v27  ;;  %v1332_v27 = vadd.f32 %v1325_v32, %v1186_v3 }
 0x5dc   : > { %v1256_v28 = vpop.f32.mrf.mxu0  ;;  %v1327_v46 = vpop.f32.mrf.mxu1 }
 0x5dd   : > { %v1819_v10 = vmul.f32 -1.442695, %v1330_v6  ;;  %v1331_v9 = vadd.f32 %v1256_v28, %v1185_v8  ;;  %v1333_v1 = vadd.f32 %v1327_v46, %v1187_v7 }
 0x5df   : > { %1949 = vpow2.f32 %v1819_v10  ;;  %v1820_v59 = vmul.f32 -1.442695, %v1331_v9  ;;  %v1821_v52 = vmul.f32 -1.442695, %v1333_v1 }
 0x5e1   : > { %1951 = vpow2.f32 %v1820_v59 }
 0x5e2   : > { %1953 = vpow2.f32 %v1821_v52 }
 0x5ec   : > { %v1950_v25 = vpop.eup %1949 }
 0x5ed   : > { %v1337_v51 = vadd.f32 1.0, %v1950_v25 }
 0x5ee   : > { %v1952_v6 = vpop.eup %1951 }
 0x5ef   : > { %1955 = vrcp.f32 %v1337_v51  ;;  %v1343_v8 = vadd.f32 1.0, %v1952_v6  ;;  %v1954_v10 = vpop.eup %1953 }
 0x5f0   : > { %1957 = vtanh.f32 %v1332_v27  ;;  %v1350_v4 = vadd.f32 1.0, %v1954_v10 }
 0x5f1   : > { %1959 = vrcp.f32 %v1343_v8 }
 0x5f2   : > { %1961 = vrcp.f32 %v1350_v4 }
 0x5fc   : > { %v1956_v59 = vpop.eup %1955 }
 0x5fd   : > { %v1958_v28 = vpop.eup %1957 }
 0x5fe   : > { %v1960_v9 = vpop.eup %1959  ;;  %v1354_v34 = vmul.f32 %v1958_v28, %v1956_v59 }
 0x5ff   : > { %v1353_v7 = vmul.f32 %v1960_v9, %v2909_v5  ;;  %v1962_v1 = vpop.eup %1961 }
 0x601   : > { %v2988_v37 = vadd.f32 %v1354_v34, %v1353_v7  ;;  %v3403_v34 = vld [vmem:[#allocation33_spill] sm:$0xff] }
 0x603   : > { %1963 = vtanh.f32 %v2988_v37 }
 0x610   : > { %v1964_v25 = vpop.eup %1963 }
 0x611   : > { %v1357_v48 = vmul.f32 %v1964_v25, %v1962_v1 }
 0x613   : > { %1435 = vmatmul.mubr.f32.vlgmr.msra.gmra.mxu0 %v1357_v48  ;;  %1506 = vmatmul.mubr.f32.vlgmr.msra.gmra.mxu1 %v1357_v48 }
 0x614   : > { %1553 = vmatpush1.msra.mxu0 %v2706_v11  ;;  %1624 = vmatpush1.msra.mxu1 %v2709_v12  ;;  %v3376_v11 = vld [vmem:[#allocation7_spill] sm:$0xff]  ;;  %v3377_v12 = vld [vmem:[#allocation8_spill] sm:$0xff] }
 0x615   : > { %1554 = vmatprep.subr.mxu0 %v2712_v13  ;;  %1625 = vmatprep.subr.mxu1 %v2715_v57  ;;  %v3378_v13 = vld [vmem:[#allocation9_spill] sm:$0xff]  ;;  %v3379_v57 = vld [vmem:[#allocation10_spill] sm:$0xff] }
 0x616   : > { %1555 = vmatpush1.msra.mxu0 %v2718_v14  ;;  %1626 = vmatpush1.msra.mxu1 %v2721_v15  ;;  %v3380_v14 = vld [vmem:[#allocation11_spill] sm:$0xff]  ;;  %v3381_v15 = vld [vmem:[#allocation12_spill] sm:$0xff] }
 0x617   : > { %1556 = vmatprep.subr.mxu0 %v2724_v16  ;;  %1627 = vmatprep.subr.mxu1 %v2727_v17  ;;  %v3382_v16 = vld [vmem:[#allocation13_spill] sm:$0xff]  ;;  %v3383_v17 = vld [vmem:[#allocation14_spill] sm:$0xff] }
 0x618   : > { %1557 = vmatpush1.msra.mxu0 %v2730_v18  ;;  %1628 = vmatpush1.msra.mxu1 %v2733_v19  ;;  %v3384_v18 = vld [vmem:[#allocation15_spill] sm:$0xff]  ;;  %v3385_v19 = vld [vmem:[#allocation16_spill] sm:$0xff] }
 0x619   : > { %1558 = vmatprep.subr.mxu0 %v2736_v20  ;;  %1629 = vmatprep.subr.mxu1 %v2739_v21  ;;  %v3386_v20 = vld [vmem:[#allocation17_spill] sm:$0xff]  ;;  %v3387_v21 = vld [vmem:[#allocation18_spill] sm:$0xff] }
 0x61a   : > { %1559 = vmatpush1.msra.mxu0 %v2742_v22  ;;  %1630 = vmatpush1.msra.mxu1 %v2745_v23  ;;  %v3388_v22 = vld [vmem:[#allocation19_spill] sm:$0xff]  ;;  %v3389_v23 = vld [vmem:[#allocation20_spill] sm:$0xff] }
 0x61b   : > { %1560 = vmatprep.subr.mxu0 %v2748_v24  ;;  %1631 = vmatprep.subr.mxu1 %v2751_v26  ;;  %v3390_v24 = vld [vmem:[#allocation21_spill] sm:$0xff]  ;;  %v3391_v26 = vld [vmem:[#allocation22_spill] sm:$0xff] }
 0x61c   : > { %1561 = vmatpush1.msra.mxu0 %v2754_v29  ;;  %1632 = vmatpush1.msra.mxu1 %v2757_v30  ;;  %v3392_v29 = vld [vmem:[#allocation23_spill] sm:$0xff]  ;;  %v3393_v30 = vld [vmem:[#allocation24_spill] sm:$0xff] }
 0x61d   : > { %1562 = vmatprep.subr.mxu0 %v2760_v31  ;;  %1633 = vmatprep.subr.mxu1 %v2763_v33  ;;  %v3394_v31 = vld [vmem:[#allocation25_spill] sm:$0xff]  ;;  %v3395_v33 = vld [vmem:[#allocation26_spill] sm:$0xff] }
 0x61e   : > { %1563 = vmatpush1.msra.mxu0 %v2766_v35  ;;  %1634 = vmatpush1.msra.mxu1 %v2769_v36  ;;  %v3396_v35 = vld [vmem:[#allocation27_spill] sm:$0xff]  ;;  %v3397_v36 = vmov 0.0  }
 0x61f   : > { %1564 = vmatprep.subr.mxu0 %v2772_v38  ;;  %1635 = vmatprep.subr.mxu1 %v2775_v39  ;;  %v3398_v38 = vld [vmem:[#allocation28_spill] sm:$0xff]  ;;  %v2111_v39 = vmov 7  }
 0x620   : > { %1565 = vmatpush1.msra.mxu0 %v2778_v40  ;;  %1636 = vmatpush1.msra.mxu1 %v2781_v41  ;;  %v3399_v40 = vld [vmem:[#allocation29_spill] sm:$0xff]  ;;  %v1360_v41 = vpop.permute.xlu1 %1359 }
 0x621   : > { %1566 = vmatprep.subr.mxu0 %v2784_v42  ;;  %1637 = vmatprep.subr.mxu1 %v2787_v43  ;;  %v3400_v42 = vld [vmem:[#allocation30_spill] sm:$0xff]  ;;  %v1364_v3 = vmul.f32 %v1360_v41, %v2455_v45 }
 0x622   : > { %1567 = vmatpush1.msra.mxu0 %v2790_v47  ;;  %1638 = vmatpush1.msra.mxu1 %v2793_v44  ;;  %v1362_v43 = vmul.f32 %v1360_v41, %v3400_v42  ;;  %v3401_v47 = vld [vmem:[#allocation31_spill] sm:$0xff] }
 0x623   : > { %1568 = vmatprep.subr.mxu0 %v2796_v49  ;;  %1639 = vmatprep.subr.mxu1 %v2799_v0  ;;  %v1363_v44 = vmul.f32 %v1360_v41, %v3401_v47  ;;  %v3402_v0 = vld [vmem:[#allocation32_spill] sm:$0xff]  ;;  %v1368_v27 = vadd.f32 %v1364_v3, %v2459_v54 }
 0x624   : > { %1569 = vmatpush1.msra.mxu0 %v2802_v63  ;;  %1640 = vmatpush1.msra.mxu1 %v2805_v55  ;;  %v1366_v49 = vadd.f32 %v1362_v43, %v2443_v2 }
 0x625   : > { %1570 = vmatprep.subr.mxu0 %v2808_v62  ;;  %1641 = vmatprep.subr.mxu1 %v2811_v60  ;;  %v1367_v63 = vadd.f32 %v1363_v44, %v3402_v0 }
 0x626   : > { %1571 = vmatpush1.msra.mxu0 %v2814_v61  ;;  %1642 = vmatpush1.msra.mxu1 %v2817_v56 }
 0x627   : > { %1572 = vmatprep.subr.mxu0 %v2820_v58  ;;  %1643 = vmatprep.subr.mxu1 %v2823_v50  ;;  %v1365_v58 = vmul.f32 %v1360_v41, %v2450_v53 }
 0x628   : > { %1573 = vmatpush1.msra.mxu0 %v3376_v11  ;;  %1644 = vmatpush1.msra.mxu1 %v3377_v12 }
 0x629   : > { %1574 = vmatprep.subr.mxu0 %v3378_v13  ;;  %1645 = vmatprep.subr.mxu1 %v3379_v57  ;;  %v1369_v46 = vadd.f32 %v1365_v58, %v3403_v34 }
 0x62a   : > { %1575 = vmatpush1.msra.mxu0 %v3380_v14  ;;  %1646 = vmatpush1.msra.mxu1 %v3381_v15 }
 0x62b   : > { %1576 = vmatprep.subr.mxu0 %v3382_v16  ;;  %1647 = vmatprep.subr.mxu1 %v3383_v17 }
 0x62c   : > { %1577 = vmatpush1.msra.mxu0 %v3384_v18  ;;  %1648 = vmatpush1.msra.mxu1 %v3385_v19 }
 0x62d   : > { %1578 = vmatprep.subr.mxu0 %v3386_v20  ;;  %1649 = vmatprep.subr.mxu1 %v3387_v21 }
 0x62e   : > { %1579 = vmatpush1.msra.mxu0 %v3388_v22  ;;  %1650 = vmatpush1.msra.mxu1 %v3389_v23 }
 0x62f   : > { %1580 = vmatprep.subr.mxu0 %v3390_v24  ;;  %1651 = vmatprep.subr.mxu1 %v3391_v26 }
 0x630   : > { %1581 = vmatpush1.msra.mxu0 %v3392_v29  ;;  %1652 = vmatpush1.msra.mxu1 %v3393_v30 }
 0x631   : > { %1582 = vmatprep.subr.mxu0 %v3394_v31  ;;  %1653 = vmatprep.subr.mxu1 %v3395_v33 }
 0x632   : > { %1583 = vmatpush1.msra.mxu0 %v3396_v35  ;;  %1616 = vmatprep.mubr.f32.mxu0 %v3397_v36 }
 0x633   : > { %1654 = vmatpush1.msra.mxu1 %v3398_v38  ;;  %1687 = vmatprep.mubr.f32.mxu1 %v3397_v36 }
 0x634   : > { %1867 = vset.pattern.permute.xlu1 %v2111_v39  ;;  %1868 = vset.pattern.permute.xlu0 %v2111_v39 }
 0x635   : > { %1541 = vperm.xlu1 %1867, %v3399_v40  }
 0x6b0   : > { %v1542_v15 = vpop.permute.xlu1 %1541 }
 0x6b1   : > { %v1544_v16 = vmul.f32 %v1542_v15, %v3400_v42  ;;  %v1545_v17 = vmul.f32 %v1542_v15, %v3401_v47  ;;  %v1547_v24 = vmul.f32 %v1542_v15, %v2450_v53  ;;  %v1546_v33 = vmul.f32 %v1542_v15, %v2455_v45 }
 0x6b3   : > { %v1548_v18 = vadd.f32 %v1544_v16, %v2443_v2  ;;  %v1549_v19 = vadd.f32 %v1545_v17, %v3402_v0  ;;  %v1551_v30 = vadd.f32 %v1547_v24, %v3403_v34  ;;  %v1550_v2 = vadd.f32 %v1546_v33, %v2459_v54 }
 0x6d3   : > { %v1436_v55 = vpop.f32.mrf.mxu0  ;;  %v1507_v50 = vpop.f32.mrf.mxu1 }
 0x6d4   : > { %v1512_v62 = vadd.f32 %v1436_v55, %v1366_v49  ;;  %v1514_v8 = vadd.f32 %v1507_v50, %v1368_v27 }
 0x6d5   : > { %v1438_v60 = vpop.f32.mrf.mxu0  ;;  %v1509_v32 = vpop.f32.mrf.mxu1 }
 0x6d6   : > { %v1822_v61 = vmul.f32 -1.442695, %v1512_v62  ;;  %v1513_v56 = vadd.f32 %v1438_v60, %v1367_v63  ;;  %v1515_v52 = vadd.f32 %v1509_v32, %v1369_v46  ;;  %v1722_v62 = vld [vmem:[#allocation2 + $0x202] ss:$0 sm:$0xff] }
 0x6d8   : > { %1965 = vpow2.f32 %v1822_v61  ;;  %v1823_v5 = vmul.f32 -1.442695, %v1513_v56  ;;  %v1824_v51 = vmul.f32 -1.442695, %v1515_v52  ;;  %v1723_v56 = vld [vmem:[#allocation2 + $0x203] ss:$0 sm:$0xff] }
 0x6da   : > { %1967 = vpow2.f32 %v1823_v5 }
 0x6db   : > { %1969 = vpow2.f32 %v1824_v51 }
 0x6e5   : > { %v1966_v6 = vpop.eup %1965 }
 0x6e6   : > { %v1519_v10 = vadd.f32 1.0, %v1966_v6 }
 0x6e7   : > { %v1968_v59 = vpop.eup %1967 }
 0x6e8   : > { %1971 = vrcp.f32 %v1519_v10  ;;  %v1525_v28 = vadd.f32 1.0, %v1968_v59  ;;  %v1970_v9 = vpop.eup %1969 }
 0x6e9   : > { %1973 = vtanh.f32 %v1514_v8  ;;  %v1532_v25 = vadd.f32 1.0, %v1970_v9 }
 0x6ea   : > { %1975 = vrcp.f32 %v1525_v28 }
 0x6eb   : > { %1977 = vrcp.f32 %v1532_v25 }
 0x6f5   : > { %v1972_v4 = vpop.eup %1971 }
 0x6f6   : > { %v1974_v7 = vpop.eup %1973 }
 0x6f7   : > { %v1976_v1 = vpop.eup %1975  ;;  %v1536_v48 = vmul.f32 %v1974_v7, %v1972_v4 }
 0x6f8   : > { %v1535_v11 = vmul.f32 %v1976_v1, %v2988_v37  ;;  %v1978_v13 = vpop.eup %1977 }
 0x6fa   : > { %v1537_v12 = vadd.f32 %v1536_v48, %v1535_v11 }
 0x6fc   : > { %1979 = vtanh.f32 %v1537_v12 }
 0x709   : > { %v1980_v57 = vpop.eup %1979 }
 0x70a   : > { %v1539_v14 = vmul.f32 %v1980_v57, %v1978_v13 }
 0x70c   : > { %1617 = vmatmul.mubr.f32.vlgmr.msra.gmra.mxu0 %v1539_v14  ;;  %1688 = vmatmul.mubr.f32.vlgmr.msra.gmra.mxu1 %v1539_v14 }
 0x7cc   : > { %v1618_v20 = vpop.f32.mrf.mxu0  ;;  %v1689_v26 = vpop.f32.mrf.mxu1 }
 0x7cd   : > { %v1694_v21 = vadd.f32 %v1618_v20, %v1548_v18  ;;  %v1696_v39 = vadd.f32 %v1689_v26, %v1550_v2 }
 0x7ce   : > { %v1620_v37 = vpop.f32.mrf.mxu0  ;;  %v1691_v31 = vpop.f32.mrf.mxu1 }
 0x7cf   : > { %v1825_v22 = vmul.f32 -1.442695, %v1694_v21  ;;  %v1695_v23 = vadd.f32 %v1620_v37, %v1549_v19  ;;  %v1697_v35 = vadd.f32 %v1691_v31, %v1551_v30 }
 0x7d1   : > { %1981 = vpow2.f32 %v1825_v22  ;;  %v1826_v29 = vmul.f32 -1.442695, %v1695_v23  ;;  %v1827_v36 = vmul.f32 -1.442695, %v1697_v35 }
 0x7d3   : > { %1983 = vpow2.f32 %v1826_v29 }
 0x7d4   : > { %1985 = vpow2.f32 %v1827_v36 }
 0x7de   : > { %v1982_v38 = vpop.eup %1981 }
 0x7df   : > { %v1701_v40 = vadd.f32 1.0, %v1982_v38 }
 0x7e0   : > { %v1984_v41 = vpop.eup %1983 }
 0x7e1   : > { %1987 = vrcp.f32 %v1701_v40  ;;  %v1707_v53 = vadd.f32 1.0, %v1984_v41  ;;  %v1986_v42 = vpop.eup %1985 }
 0x7e2   : > { %1989 = vtanh.f32 %v1696_v39  ;;  %v1714_v49 = vadd.f32 1.0, %v1986_v42 }
 0x7e3   : > { %1991 = vrcp.f32 %v1707_v53 }
 0x7e4   : > { %1993 = vrcp.f32 %v1714_v49 }
 0x7ee   : > { %v1988_v43 = vpop.eup %1987 }
 0x7ef   : > { %v1990_v47 = vpop.eup %1989 }
 0x7f0   : > { %v1992_v44 = vpop.eup %1991  ;;  %v1718_v45 = vmul.f32 %v1990_v47, %v1988_v43 }
 0x7f1   : > { %v1717_v0 = vmul.f32 %v1992_v44, %v1537_v12  ;;  %v1994_v54 = vpop.eup %1993 }
 0x7f3   : > { %v1719_v63 = vadd.f32 %v1718_v45, %v1717_v0 }
 0x7f5   : > { %1995 = vtanh.f32 %v1719_v63 }
 0x802   : > { %v1996_v55 = vpop.eup %1995 }
 0x803   : > { %v1721_v60 = vmul.f32 %v1996_v55, %v1994_v54 }
 0x805   : > { %v1724_v61 = vmul.f32 %v1722_v62, %v1721_v60 }
 0x807   : > { %1725 = vadd.xlane.f32.xlu0 %v1724_v61 }
 0x890   : > { %v1726_v58 = vpop.xlane.xlu0 %1725 }
 0x891   : > { %v1727_v50 = vadd.f32 %v1726_v58, %v1723_v56 }
 0x893   : > { %1729 = vst.msk [vmem:[%s153_s25] sm:$0xff] %vm1728_vm0, %v1727_v50 }
 0x894 PF: > { %s13_s9 = sadd.s32 1, %s2098_s9  }
 0x895   : > { %p10_p1 = scmp.ge.s32.totalorder %s13_s9, 4  }
 0x897   :  { %12 = sbr.rel (!%p10_p1) target bundleno = 1 (0x1), region = 65 }
 0x89c   :  { %1749 = vsyncpa [#allocation3], 1 }
 0x89d   :  { %1751 = vsyncpa [#allocation3 + $0x1], 1 }

</bundles_post_ra>
